<compile_context>
chip_gen: v5e
topology: v5e:2x2
jax: 0.10.0
libtpu: 0.0.40
codegen_flags: <defaults>
</compile_context>

<pallas_src>
import functools

import jax
import jax.numpy as jnp
import numpy as np
from jax.experimental import pallas as pl
from jax.experimental.pallas import tpu as pltpu


CIN, C0, C1 = 3, 64, 64      # VGG16 features[0] / features[2] channel counts
K0 = 32                      # conv0 im2col contraction (27 real taps, zero-padded)
K1 = 3 * C0                  # conv1 contraction after the kh concat (=192)


# ----------------------------------------------------------------------------
# Generation-gated VMEM budgets.
# ----------------------------------------------------------------------------
def _vmem_budgets():
    """Returns (vmem_limit_bytes, per-tile working-set budget)."""
    phys = 64 * 1024 * 1024                      # conservative default (v7x-class)
    try:
        phys = int(pltpu.get_tpu_info().vmem_capacity_bytes)
    except Exception:
        pass
    if phys <= 64 * 1024 * 1024:                 # v7x: 64 MiB physical per TC
        return 40 * 1024 * 1024, 12 * 1024 * 1024
    return 96 * 1024 * 1024, 28 * 1024 * 1024    # v5e / v6e: 128 MiB physical


def _pick_block_h(H, W, budget):
    """Largest row-tile TH with H % TH == 0, (TH*W) % 128 == 0 (lane-dense output
    stores) and an estimated fused working set within `budget`."""
    # Rough bytes per output row: lane-padded im2col block (x2 buffers), f32 conv0
    # slab + shifted copies, bf16 matmul LHS, f32 accumulator, f32 output (x2).
    per_row = W * 3328
    cap = max(1, min(H, budget // per_row))
    for th in range(cap, 0, -1):
        if H % th == 0 and (th == H or (th * W) % 128 == 0):
            return th
    return H


# ----------------------------------------------------------------------------
# Fused Conv3x3(3->64)+ReLU -> Conv3x3(64->64)+ReLU kernel.
# One grid step = one (image, row-tile of TH output rows).
# ----------------------------------------------------------------------------
def _fused_conv_kernel(x_ref, w0_ref, b0_ref, w1_ref, b1_ref, o_ref, *, TH, W, H):
    # x_ref : (1, 1, (TH+2)*W, 32) bf16  conv0 im2col patches, rows [r0-1, r0+TH+1)
    # w0_ref: (32, 64)   bf16            conv0 weights, (kh,kw,cin) flat, zero padded
    # b0_ref: (1, 64)    f32
    # w1_ref: (3, 192, 64) bf16          conv1 weights per kw, (kh,cin) flat on K
    # b1_ref: (1, 64)    f32
    # o_ref : (1, 64, TH*W) f32          channel-major output tile (spatial on lanes)
    t = pl.program_id(1)
    R = (TH + 2) * W

    # ---- conv0: ONE MXU matmul (K=32) + fused bias + ReLU --------------------
    y0 = jnp.dot(x_ref[0, 0], w0_ref[...], preferred_element_type=jnp.float32)
    y0 = jnp.maximum(y0 + b0_ref[...], 0.0)                        # (R, 64) f32

    # Row / column index helpers (built without integer div/mod).
    ri = jax.lax.broadcasted_iota(jnp.int32, (TH + 2, W, 1), 0).reshape(R, 1)
    ci = jax.lax.broadcasted_iota(jnp.int32, (TH + 2, W, 1), 1).reshape(R, 1)

    # conv1 SAME row padding: halo rows outside the image must be exact zeros
    # (not relu(bias)); only the first / last tile has such rows.
    g = t * TH - 1 + ri                                             # global conv0 row
    y0 = jnp.where((g >= 0) & (g < H), y0, 0.0)

    # ---- conv1: kw = -1/0/+1 shifts on the flat (row*W) axis + wrap masks -----
    zrow = jnp.zeros((1, C0), jnp.float32)
    y0p = jnp.concatenate([zrow, y0, zrow], axis=0)                 # (R+2, 64)
    slab_l = jnp.where(ci != 0,     y0p[0:R],     0.0)              # reads column j-1
    slab_c = y0                                                     # column j
    slab_r = jnp.where(ci != W - 1, y0p[2:R + 2], 0.0)              # reads column j+1

    # 3 matmuls with K = 3*64 = 192 (kh folded into the contraction).
    acc = jnp.zeros((TH * W, C1), jnp.float32)
    for kw, slab in enumerate((slab_l, slab_c, slab_r)):
        lhs = jnp.concatenate(
            [slab[kh * W: kh * W + TH * W] for kh in range(3)],
            axis=1).astype(jnp.bfloat16)                            # (TH*W, 192)
        acc = acc + jnp.dot(lhs, w1_ref[kw], preferred_element_type=jnp.float32)

    acc = jnp.maximum(acc + b1_ref[...], 0.0)
    # Channel-major store: TH*W (a multiple of 128) lands on lanes -> dense stores,
    # and the wrapper reshape to NCHW is free (no post-kernel transpose).
    o_ref[0] = jnp.transpose(acc, (1, 0))


def fused_conv0_conv1(x27t, w0r, b0, w1r, b1, *, H, W, TH):
    N = x27t.shape[0]
    nT = H // TH
    R = (TH + 2) * W
    vmem_limit, _ = _vmem_budgets()

    kernel = functools.partial(_fused_conv_kernel, TH=TH, W=W, H=H)
    cost = pl.CostEstimate(
        flops=2 * N * H * W * C0 * (27 + 9 * C0),
        transcendentals=0,
        bytes_accessed=(x27t.size * x27t.dtype.itemsize
                        + w0r.size * w0r.dtype.itemsize
                        + w1r.size * w1r.dtype.itemsize
                        + b0.size * 4 + b1.size * 4
                        + N * C1 * H * W * 4))

    return pl.pallas_call(
        kernel,
        out_shape=jax.ShapeDtypeStruct((N, C1, H * W), jnp.float32),
        grid=(N, nT),
        in_specs=[
            pl.BlockSpec((1, 1, R, K0), lambda n, t: (n, t, 0, 0)),
            pl.BlockSpec((K0, C0), lambda n, t: (0, 0)),
            pl.BlockSpec((1, C0), lambda n, t: (0, 0)),
            pl.BlockSpec((3, K1, C1), lambda n, t: (0, 0, 0)),
            pl.BlockSpec((1, C1), lambda n, t: (0, 0)),
        ],
        out_specs=pl.BlockSpec((1, C1, TH * W), lambda n, t: (n, 0, t)),
        compiler_params=pltpu.CompilerParams(
            dimension_semantics=("parallel", "parallel"),
            vmem_limit_bytes=vmem_limit),
        cost_estimate=cost,
    )(x27t, w0r, b0.reshape(1, C0), w1r, b1.reshape(1, C1))


# ----------------------------------------------------------------------------
# Wrapper-side layout plumbing for the Cin=3 first conv.
# ----------------------------------------------------------------------------
def _build_conv0_patches(x_nchw, TH):
    """Im2col of the tiny RGB input: (N, nT, (TH+2)*W, 32) bf16 patches.

    Tile t carries the rows needed for conv0 outputs [t*TH-1, t*TH+TH+1) (1-row
    halo for the fused conv1); the 27 (kh,kw,cin) taps sit on the contraction
    axis (zero padded to 32), keeping Cin=3 off the 128-lane axis.
    """
    N, C, H, W = x_nchw.shape
    nT = H // TH
    xp = jnp.pad(x_nchw, ((0, 0), (0, 0), (2, 2), (1, 1)))          # SAME pad + halo
    taps = [xp[:, :, kh:kh + H + 2, kw:kw + W]
            for kh in range(3) for kw in range(3)]                  # (N, 3, H+2, W)
    x27 = jnp.stack(taps, axis=2)                                   # (N, 3, 9, H+2, W)
    x27 = x27.transpose(0, 3, 4, 2, 1).reshape(N, H + 2, W, 27)     # K=(kh*3+kw)*3+cin
    x27 = jnp.pad(x27, ((0, 0), (0, 0), (0, 0), (0, K0 - 27)))
    tiles = [x27[:, t * TH: t * TH + TH + 2] for t in range(nT)]    # 2-row overlap
    xt = jnp.stack(tiles, axis=1)                                   # (N, nT, TH+2, W, 32)
    return xt.reshape(N, nT, (TH + 2) * W, K0).astype(jnp.bfloat16)


# ----------------------------------------------------------------------------
# Deterministic synthetic parameters (shapes of vgg16.features[:10] convs).
# (Pretrained torchvision weights cannot be downloaded in-script.)
# ----------------------------------------------------------------------------
def init_params(key):
    chans = [(3, 64), (64, 64), (64, 128), (128, 128)]
    params = []
    for i, (cin, cout) in enumerate(chans):
        kw_, kb_ = jax.random.split(jax.random.fold_in(key, i))
        w = 0.05 * jax.random.normal(kw_, (3, 3, cin, cout), jnp.float32)  # HWIO
        b = 0.05 * jax.random.normal(kb_, (cout,), jnp.float32)
        params.append((w, b))
    return params


def vgg16_forward(x_nchw, params, *, block_h=None):
    """VGG16.forward equivalent: list with the NCHW activation captured after
    features[3].  features[4:10] do not reach the returned value and are not run."""
    N, C, H, W = x_nchw.shape
    assert C == CIN and H >= 2
    w0, b0 = params[0]
    w1, b1 = params[1]

    _, tile_budget = _vmem_budgets()
    TH = _pick_block_h(H, W, tile_budget) if block_h is None else block_h
    assert H % TH == 0 and (TH == H or (TH * W) % 128 == 0)

    x27t = _build_conv0_patches(x_nchw.astype(jnp.float32), TH)
    w0r = jnp.pad(w0.reshape(27, C0), ((0, K0 - 27), (0, 0))).astype(jnp.bfloat16)
    w1r = w1.transpose(1, 0, 2, 3).reshape(3, K1, C1).astype(jnp.bfloat16)

    out = fused_conv0_conv1(x27t, w0r, b0, w1r, b1, H=H, W=W, TH=TH)
    return [out.reshape(N, C1, H, W)]          # free reshape; already channel-major


# ----------------------------------------------------------------------------
# Pure-JAX reference (same bf16 rounding points) for correctness checking.
# ----------------------------------------------------------------------------
def _ref_conv_relu(x_nhwc, w, b, out_dtype):
    y = jax.lax.conv_general_dilated(
        x_nhwc, w, window_strides=(1, 1), padding="SAME",
        dimension_numbers=("NHWC", "HWIO", "NHWC"),
        preferred_element_type=jnp.float32)
    return jnp.maximum(y + b, 0.0).astype(out_dtype)


def vgg16_reference(x_nchw, params):
    x = jnp.transpose(x_nchw, (0, 2, 3, 1)).astype(jnp.bfloat16)
    w0, b0 = params[0]
    w1, b1 = params[1]
    x = _ref_conv_relu(x, w0.astype(jnp.bfloat16), b0, jnp.bfloat16)
    x = _ref_conv_relu(x, w1.astype(jnp.bfloat16), b1, jnp.float32)
    return jnp.transpose(x, (0, 3, 1, 2))


if __name__ == "__main__":
    key = jax.random.PRNGKey(0)
    k_in, k_p = jax.random.split(key)
    # Small NCHW input; the first VGG conv requires 3 (RGB) channels.
    x = jax.random.normal(k_in, (2, 3, 16, 16), jnp.float32)
    params = init_params(k_p)

    ref = jax.block_until_ready(vgg16_reference(x, params))

    # Multi-tile path (block_h=8 -> 2 row tiles per image): exercises the halo,
    # the boundary-row zeroing and the flat-offset kw shifts.
    fwd = jax.jit(functools.partial(vgg16_forward, block_h=8))
    out = jax.block_until_ready(fwd(x, params)[0])
    np.testing.assert_allclose(np.asarray(out, np.float32),
                               np.asarray(ref, np.float32),
                               rtol=5e-3, atol=5e-3)

    # Auto-tiled path (generation-gated budget picks TH = H -> single tile).
    fwd_auto = jax.jit(vgg16_forward)
    out_auto = jax.block_until_ready(fwd_auto(x, params)[0])
    np.testing.assert_allclose(np.asarray(out_auto, np.float32),
                               np.asarray(ref, np.float32),
                               rtol=5e-3, atol=5e-3)

    assert out.shape == (2, 64, 16, 16)
    print("KERNEL_OK")
</pallas_src>

<mosaic_0001>
module attributes {stable_mosaic.version = 11 : i64} {
  func.func @_fused_conv_kernel(%arg0: i32, %arg1: i32, %arg2: memref<1x1x160x32xbf16, #tpu.memory_space<vmem>>, %arg3: memref<32x64xbf16, #tpu.memory_space<vmem>>, %arg4: memref<1x64xf32, #tpu.memory_space<vmem>>, %arg5: memref<3x192x64xbf16, #tpu.memory_space<vmem>>, %arg6: memref<1x64xf32, #tpu.memory_space<vmem>>, %arg7: memref<1x64x128xf32, #tpu.memory_space<vmem>>) attributes {dimension_semantics = [#tpu.dimension_semantics<parallel>, #tpu.dimension_semantics<parallel>], iteration_bounds = array<i64: 2, 2>, scalar_prefetch = 0 : i64, scratch_operands = 0 : i64, tpu.core_type = #tpu.core_type<tc>, window_params = [{transform_indices = @transform_0, window_bounds = array<i64: 1, 1, 160, 32>}, {pipeline_mode = #tpu.pipeline_mode<synchronous>, transform_indices = @transform_1, window_bounds = array<i64: 32, 64>}, {pipeline_mode = #tpu.pipeline_mode<synchronous>, transform_indices = @transform_2, window_bounds = array<i64: 1, 64>}, {pipeline_mode = #tpu.pipeline_mode<synchronous>, transform_indices = @transform_3, window_bounds = array<i64: 3, 192, 64>}, {pipeline_mode = #tpu.pipeline_mode<synchronous>, transform_indices = @transform_4, window_bounds = array<i64: 1, 64>}, {transform_indices = @transform_5, window_bounds = array<i64: 1, 64, 128>}]} {
    %c0 = arith.constant 0 : index
    %c0_0 = arith.constant 0 : index
    %c0_1 = arith.constant 0 : index
    %c0_2 = arith.constant 0 : index
    %0 = vector.load %arg2[%c0, %c0_0, %c0_1, %c0_2] : memref<1x1x160x32xbf16, #tpu.memory_space<vmem>>, vector<1x1x160x32xbf16>
    %1 = vector.shape_cast %0 : vector<1x1x160x32xbf16> to vector<160x32xbf16>
    %c0_3 = arith.constant 0 : index
    %c0_4 = arith.constant 0 : index
    %2 = vector.load %arg3[%c0_3, %c0_4] : memref<32x64xbf16, #tpu.memory_space<vmem>>, vector<32x64xbf16>
    %cst = arith.constant dense<0.000000e+00> : vector<160x64xf32>
    %3 = tpu.matmul %1, %2, %cst {dimension_numbers = #tpu.dot_dimension_numbers<[1], [0], [0], [1], [0, 0, 1, 1], [], []>} : vector<160x32xbf16>, vector<32x64xbf16>, vector<160x64xf32> -> vector<160x64xf32>
    %c0_5 = arith.constant 0 : index
    %c0_6 = arith.constant 0 : index
    %4 = vector.load %arg4[%c0_5, %c0_6] : memref<1x64xf32, #tpu.memory_space<vmem>>, vector<1x64xf32>
    %5 = vector.broadcast %4 : vector<1x64xf32> to vector<160x64xf32>
    %6 = arith.addf %3, %5 : vector<160x64xf32>
    %cst_7 = arith.constant 0.000000e+00 : f32
    %7 = vector.broadcast %cst_7 : f32 to vector<160x64xf32>
    %8 = arith.maximumf %6, %7 : vector<160x64xf32>
    %9 = tpu.iota {dimensions = array<i32: 0>} : vector<10x16x1xi32>
    %10 = vector.shape_cast %9 : vector<10x16x1xi32> to vector<160x1xi32>
    %11 = tpu.iota {dimensions = array<i32: 1>} : vector<10x16x1xi32>
    %12 = vector.shape_cast %11 : vector<10x16x1xi32> to vector<160x1xi32>
    %c8_i32 = arith.constant 8 : i32
    %13 = arith.muli %arg1, %c8_i32 : i32
    %c1_i32 = arith.constant 1 : i32
    %14 = arith.subi %13, %c1_i32 : i32
    %15 = vector.broadcast %14 : i32 to vector<160x1xi32>
    %16 = arith.addi %15, %10 : vector<160x1xi32>
    %c0_i32 = arith.constant 0 : i32
    %17 = vector.broadcast %c0_i32 : i32 to vector<160x1xi32>
    %18 = arith.cmpi sge, %16, %17 : vector<160x1xi32>
    %c16_i32 = arith.constant 16 : i32
    %19 = vector.broadcast %c16_i32 : i32 to vector<160x1xi32>
    %20 = arith.cmpi slt, %16, %19 : vector<160x1xi32>
    %21 = arith.andi %18, %20 : vector<160x1xi1>
    %cst_8 = arith.constant 0.000000e+00 : f32
    %22 = vector.shape_cast %21 : vector<160x1xi1> to vector<160x1xi1>
    %23 = vector.broadcast %22 : vector<160x1xi1> to vector<160x64xi1>
    %24 = vector.broadcast %cst_8 : f32 to vector<160x64xf32>
    %25 = arith.select %23, %8, %24 : vector<160x64xi1>, vector<160x64xf32>
    %cst_9 = arith.constant 0.000000e+00 : f32
    %26 = vector.broadcast %cst_9 : f32 to vector<1x64xf32>
    %27 = tpu.concatenate %26, %25, %26 in 0 : vector<1x64xf32>, vector<160x64xf32>, vector<1x64xf32> -> vector<162x64xf32>
    %c0_i32_10 = arith.constant 0 : i32
    %28 = vector.broadcast %c0_i32_10 : i32 to vector<160x1xi32>
    %29 = arith.cmpi ne, %12, %28 : vector<160x1xi32>
    %30 = vector.extract_strided_slice %27 {offsets = [0, 0], sizes = [160, 64], strides = [1, 1]} : vector<162x64xf32> to vector<160x64xf32>
    %cst_11 = arith.constant 0.000000e+00 : f32
    %31 = vector.shape_cast %29 : vector<160x1xi1> to vector<160x1xi1>
    %32 = vector.broadcast %31 : vector<160x1xi1> to vector<160x64xi1>
    %33 = vector.broadcast %cst_11 : f32 to vector<160x64xf32>
    %34 = arith.select %32, %30, %33 : vector<160x64xi1>, vector<160x64xf32>
    %c15_i32 = arith.constant 15 : i32
    %35 = vector.broadcast %c15_i32 : i32 to vector<160x1xi32>
    %36 = arith.cmpi ne, %12, %35 : vector<160x1xi32>
    %37 = vector.extract_strided_slice %27 {offsets = [2, 0], sizes = [160, 64], strides = [1, 1]} : vector<162x64xf32> to vector<160x64xf32>
    %cst_12 = arith.constant 0.000000e+00 : f32
    %38 = vector.shape_cast %36 : vector<160x1xi1> to vector<160x1xi1>
    %39 = vector.broadcast %38 : vector<160x1xi1> to vector<160x64xi1>
    %40 = vector.broadcast %cst_12 : f32 to vector<160x64xf32>
    %41 = arith.select %39, %37, %40 : vector<160x64xi1>, vector<160x64xf32>
    %cst_13 = arith.constant 0.000000e+00 : f32
    %42 = vector.broadcast %cst_13 : f32 to vector<128x64xf32>
    %43 = vector.extract_strided_slice %34 {offsets = [0, 0], sizes = [128, 64], strides = [1, 1]} : vector<160x64xf32> to vector<128x64xf32>
    %44 = vector.extract_strided_slice %34 {offsets = [16, 0], sizes = [128, 64], strides = [1, 1]} : vector<160x64xf32> to vector<128x64xf32>
    %45 = vector.extract_strided_slice %34 {offsets = [32, 0], sizes = [128, 64], strides = [1, 1]} : vector<160x64xf32> to vector<128x64xf32>
    %46 = tpu.concatenate %43, %44, %45 in 1 : vector<128x64xf32>, vector<128x64xf32>, vector<128x64xf32> -> vector<128x192xf32>
    %47 = arith.truncf %46 : vector<128x192xf32> to vector<128x192xbf16>
    %c0_14 = arith.constant 0 : index
    %c0_15 = arith.constant 0 : index
    %c0_16 = arith.constant 0 : index
    %48 = vector.load %arg5[%c0_14, %c0_15, %c0_16] : memref<3x192x64xbf16, #tpu.memory_space<vmem>>, vector<1x192x64xbf16>
    %49 = vector.shape_cast %48 : vector<1x192x64xbf16> to vector<192x64xbf16>
    %cst_17 = arith.constant dense<0.000000e+00> : vector<128x64xf32>
    %50 = tpu.matmul %47, %49, %cst_17 {dimension_numbers = #tpu.dot_dimension_numbers<[1], [0], [0], [1], [0, 0, 1, 1], [], []>} : vector<128x192xbf16>, vector<192x64xbf16>, vector<128x64xf32> -> vector<128x64xf32>
    %51 = arith.addf %42, %50 : vector<128x64xf32>
    %52 = vector.extract_strided_slice %25 {offsets = [0, 0], sizes = [128, 64], strides = [1, 1]} : vector<160x64xf32> to vector<128x64xf32>
    %53 = vector.extract_strided_slice %25 {offsets = [16, 0], sizes = [128, 64], strides = [1, 1]} : vector<160x64xf32> to vector<128x64xf32>
    %54 = vector.extract_strided_slice %25 {offsets = [32, 0], sizes = [128, 64], strides = [1, 1]} : vector<160x64xf32> to vector<128x64xf32>
    %55 = tpu.concatenate %52, %53, %54 in 1 : vector<128x64xf32>, vector<128x64xf32>, vector<128x64xf32> -> vector<128x192xf32>
    %56 = arith.truncf %55 : vector<128x192xf32> to vector<128x192xbf16>
    %c1 = arith.constant 1 : index
    %c0_18 = arith.constant 0 : index
    %c0_19 = arith.constant 0 : index
    %57 = vector.load %arg5[%c1, %c0_18, %c0_19] : memref<3x192x64xbf16, #tpu.memory_space<vmem>>, vector<1x192x64xbf16>
    %58 = vector.shape_cast %57 : vector<1x192x64xbf16> to vector<192x64xbf16>
    %cst_20 = arith.constant dense<0.000000e+00> : vector<128x64xf32>
    %59 = tpu.matmul %56, %58, %cst_20 {dimension_numbers = #tpu.dot_dimension_numbers<[1], [0], [0], [1], [0, 0, 1, 1], [], []>} : vector<128x192xbf16>, vector<192x64xbf16>, vector<128x64xf32> -> vector<128x64xf32>
    %60 = arith.addf %51, %59 : vector<128x64xf32>
    %61 = vector.extract_strided_slice %41 {offsets = [0, 0], sizes = [128, 64], strides = [1, 1]} : vector<160x64xf32> to vector<128x64xf32>
    %62 = vector.extract_strided_slice %41 {offsets = [16, 0], sizes = [128, 64], strides = [1, 1]} : vector<160x64xf32> to vector<128x64xf32>
    %63 = vector.extract_strided_slice %41 {offsets = [32, 0], sizes = [128, 64], strides = [1, 1]} : vector<160x64xf32> to vector<128x64xf32>
    %64 = tpu.concatenate %61, %62, %63 in 1 : vector<128x64xf32>, vector<128x64xf32>, vector<128x64xf32> -> vector<128x192xf32>
    %65 = arith.truncf %64 : vector<128x192xf32> to vector<128x192xbf16>
    %c2 = arith.constant 2 : index
    %c0_21 = arith.constant 0 : index
    %c0_22 = arith.constant 0 : index
    %66 = vector.load %arg5[%c2, %c0_21, %c0_22] : memref<3x192x64xbf16, #tpu.memory_space<vmem>>, vector<1x192x64xbf16>
    %67 = vector.shape_cast %66 : vector<1x192x64xbf16> to vector<192x64xbf16>
    %cst_23 = arith.constant dense<0.000000e+00> : vector<128x64xf32>
    %68 = tpu.matmul %65, %67, %cst_23 {dimension_numbers = #tpu.dot_dimension_numbers<[1], [0], [0], [1], [0, 0, 1, 1], [], []>} : vector<128x192xbf16>, vector<192x64xbf16>, vector<128x64xf32> -> vector<128x64xf32>
    %69 = arith.addf %60, %68 : vector<128x64xf32>
    %c0_24 = arith.constant 0 : index
    %c0_25 = arith.constant 0 : index
    %70 = vector.load %arg6[%c0_24, %c0_25] : memref<1x64xf32, #tpu.memory_space<vmem>>, vector<1x64xf32>
    %71 = vector.broadcast %70 : vector<1x64xf32> to vector<128x64xf32>
    %72 = arith.addf %69, %71 : vector<128x64xf32>
    %cst_26 = arith.constant 0.000000e+00 : f32
    %73 = vector.broadcast %cst_26 : f32 to vector<128x64xf32>
    %74 = arith.maximumf %72, %73 : vector<128x64xf32>
    %75 = tpu.transpose %74, [1, 0] : vector<128x64xf32> -> vector<64x128xf32>
    %c0_27 = arith.constant 0 : index
    %c0_28 = arith.constant 0 : index
    %c0_29 = arith.constant 0 : index
    %76 = vector.load %arg7[%c0_27, %c0_28, %c0_29] : memref<1x64x128xf32, #tpu.memory_space<vmem>>, vector<1x64x128xf32>
    %77 = vector.shape_cast %76 : vector<1x64x128xf32> to vector<64x128xf32>
    %78 = vector.shape_cast %75 : vector<64x128xf32> to vector<1x64x128xf32>
    tpu.vector_store %arg7[%c0_27, %c0_28, %c0_29], %78 {strides = array<i32>} : memref<1x64x128xf32, #tpu.memory_space<vmem>>, vector<1x64x128xf32>,
    return
  }
  func.func @transform_0(%arg0: i32, %arg1: i32) -> (i32, i32, i32, i32) {
    %c0_i32 = arith.constant 0 : i32
    %c0_i32_0 = arith.constant 0 : i32
    %c0_i32_1 = arith.constant 0 : i32
    return %arg0, %arg1, %c0_i32, %c0_i32_0 : i32, i32, i32, i32
  }
  func.func @transform_1(%arg0: i32, %arg1: i32) -> (i32, i32) {
    %c0_i32 = arith.constant 0 : i32
    %c0_i32_0 = arith.constant 0 : i32
    %c0_i32_1 = arith.constant 0 : i32
    return %c0_i32, %c0_i32_0 : i32, i32
  }
  func.func @transform_2(%arg0: i32, %arg1: i32) -> (i32, i32) {
    %c0_i32 = arith.constant 0 : i32
    %c0_i32_0 = arith.constant 0 : i32
    %c0_i32_1 = arith.constant 0 : i32
    return %c0_i32, %c0_i32_0 : i32, i32
  }
  func.func @transform_3(%arg0: i32, %arg1: i32) -> (i32, i32, i32) {
    %c0_i32 = arith.constant 0 : i32
    %c0_i32_0 = arith.constant 0 : i32
    %c0_i32_1 = arith.constant 0 : i32
    %c0_i32_2 = arith.constant 0 : i32
    return %c0_i32, %c0_i32_0, %c0_i32_1 : i32, i32, i32
  }
  func.func @transform_4(%arg0: i32, %arg1: i32) -> (i32, i32) {
    %c0_i32 = arith.constant 0 : i32
    %c0_i32_0 = arith.constant 0 : i32
    %c0_i32_1 = arith.constant 0 : i32
    return %c0_i32, %c0_i32_0 : i32, i32
  }
  func.func @transform_5(%arg0: i32, %arg1: i32) -> (i32, i32, i32) {
    %c0_i32 = arith.constant 0 : i32
    %c0_i32_0 = arith.constant 0 : i32
    return %arg0, %c0_i32, %arg1 : i32, i32, i32
  }
}

</mosaic_0001>

<bundles_post_ra>
// kernel: vgg16_forward.1
= control target key start
LH: loop header
LB: loop body
LE: loop exit
PB: predicated region body
PF: predicated region fallthrough
CT: control target
= control target key end

     0   :  { %s2522_s18 = smov 0   ;;  %s2524_s19 = smov 0   ;;  %s3496_s0 = inlined_call_operand.vmem [shape: bf16[2,2,160,32], index: 0, kind: input, shape index: {}]   ;;  %s3497_s1 = inlined_call_operand.vmem [shape: bf16[32,64], index: 1, kind: input, shape index: {}]   ;;  %s3498_s2 = inlined_call_operand.vmem [shape: f32[1,64], index: 2, kind: input, shape index: {}]   ;;  %s3499_s3 = inlined_call_operand.vmem [shape: bf16[3,192,64], index: 3, kind: input, shape index: {}]   ;;  %s3500_s4 = inlined_call_operand.vmem [shape: f32[1,64], index: 4, kind: input, shape index: {}]   ;;  %s3501_s5 = inlined_call_operand.vmem [shape: f32[2,64,256], index: 5, kind: output, shape index: {}]  }
   0x1   :  { %s2526_s20 = smov 0   ;;  %s2528_s21 = smov 0  }
   0x2   :  { %s2530_s22 = smov 0   ;;  %s2532_s23 = smov 0  }
   0x3   :  { %s2534_s24 = smov 0  }
   0x4 LB: > { %s24_s25 = sadd.s32 1, %s2481_s22  ;;  %s27_s26 = sadd.s32 1, %s2485_s23  ;;  %s2489_s24 = sphi %s2534_s24, %s15_s24   ;;  %s2485_s23 = sphi %s2532_s23, %s3585_s23   ;;  %s2481_s22 = sphi %s2530_s22, %s3584_s22   ;;  %s2477_s21 = sphi %s2528_s21, %s3583_s21   ;;  %s2473_s20 = sphi %s2526_s20, %s3582_s20   ;;  %s2469_s19 = sphi %s2524_s19, %s3581_s19   ;;  %s2465_s18 = sphi %s2522_s18, %s3580_s18  }
   0x5   : > { %p25_p0 = scmp.ge.s32.totalorder %s24_s25, 2  ;;  %s1898_s27 = sadd.s32 4294967295, %s2489_s24  }
   0x6   : > { %p158_p1 = scmp.ne.s32.totalorder %s2469_s19, %s2465_s18  ;;  %p159_p2 = scmp.eq.s32.totalorder %s1898_s27, 3 }
   0x7   : > { %s3587_s25 = smov (%p25_p0, %s24_s25), 0  ;;  %s3589_s26 = smov (!%p25_p0, %s27_s26), %s2485_s23 }
   0x8   : > { %s144_s28 = ssub.s32 %s2481_s22, %s3587_s25  ;;  %p29_p3 = scmp.ge.s32.totalorder %s3589_s26, 2 }
   0x9   : > { %p1902_p4 = scmp.ge.s32.totalorder %s2489_s24, 1  ;;  %p2568_p5 = por %p159_p2, %p158_p1 }
   0xa   : > { %p207_p6 = scmp.lt.s32.totalorder %s2489_s24, 5  ;;  %s3591_s26 = smov (%p29_p3, %s3589_s26), 0 }
   0xb   : > { %s143_s30 = ssub.s32 %s2485_s23, %s3591_s26  ;;  %s148_s7 = sadd.s32 1, %s2469_s19 }
   0xc   : > { %p208_p7 = pnand %p1902_p4, %p207_p6  ;;  %s145_s6 = sor.u32 %s144_s28, %s143_s30 }
   0xd   : > { %p146_p8 = scmp.eq.s32.totalorder %s145_s6, 0 }
   0xe   : > { %211 = sbr.rel (%p208_p7) target bundleno = 858 (0x35a), region = 40 }
   0xf   : > { %s2579_s8 = scalar_select %p146_p8, %s2469_s19, %s148_s7  }
  0x13   : > { %v2197_v0 = vld [vmem:[%s3497_s1 + $0x8] sm:$0xff]  ;;  %p238_p9 = scmp.lt.s32.totalorder %s2477_s21, 1  ;;  %p240_p10 = scmp.lt.s32.totalorder %s2473_s20, 1  ;;  %v2196_v1 = vld [vmem:[%s3497_s1] sm:$0xff]  ;;  %vm338_vm0 = vcmask 261120   ;;  %v2221_v13 = vld [vmem:[%s3499_s3 + $0xb8] sm:$0xff]  ;;  %v448_v59 = vlaneseq }
  0x14   : > { %375 = vmatpush.bf16.msra.mxu0 %v2197_v0  ;;  %s1963_s7 = sshll.u32 %s2473_s20, 3  ;;  %v2618_v11 = vld [vmem:[%s3498_s2] ss:$0 sm:$0xff]  ;;  %1107 = vmatpush.bf16.msra.mxu2 %v2221_v13  ;;  %v2220_v17 = vld [vmem:[%s3499_s3 + $0xb0] sm:$0xff]  ;;  %v2219_v19 = vld [vmem:[%s3499_s3 + $0xa8] sm:$0xff]  ;;  %vm553_vm4 = vcmask 1040384  }
  0x15   : > { %s239_s13 = scalar_select %p238_p9, %s2477_s21, 1  ;;  %v2218_v25 = vld [vmem:[%s3499_s3 + $0xa0] sm:$0xff]  ;;  %vm650_vm7 = vcmask 1045504   ;;  %vm796_vm12 = vcmask 523264   ;;  %v2697_v63 = vshrl.u32 %v448_v59, 7 }
  0x16   : > { %s241_s14 = scalar_select %p240_p10, %s2473_s20, 1 }
  0x17   : > { %s2255_s15 = smul.u32 40, %s239_s13  ;;  %s1964_s9 = sadd.s32 4294967295, %s1963_s7 }
  0x18   : > { %s2254_s16 = smul.u32 20, %s241_s14  ;;  %376 = vmatpush.bf16.msra.mxu0 %v2196_v1  ;;  %v2613_v10 = vstv %s1964_s9  ;;  %1108 = vmatpush.bf16.msra.mxu2 %v2220_v17  ;;  %s2491_s30 = smov 64  }
  0x19   : > { %vm463_vm1 = vcmp.ge.s32.totalorder %v2613_v10, 0  ;;  %vm473_vm2 = vcmp.lt.s32.totalorder %v2613_v10, 16  ;;  %v454_v24 = vadd.s32 1, %v2613_v10  ;;  %v455_v45 = vadd.s32 2, %v2613_v10  ;;  %s235_s28 = sand.u32 1, %s2465_s18   ;;  %s2182_s18 = sshll.u32 (%p2568_p5), %s2477_s21, 4 }
  0x1a   : > { %s244_s17 = sadd.s32 %s2255_s15, %s2254_s16  ;;  %vm483_vm3 = vmand %vm463_vm1, %vm473_vm2  ;;  %v456_v51 = vadd.s32 3, %v2613_v10  ;;  %s1761_s7 = sadd.s32 (%p2568_p5), %s2473_s20, %s2182_s18 }
  0x1b   : > { %s1904_s27 = sshll.u32 %s244_s17, 2  ;;  %vm464_vm5 = vcmp.ge.s32.totalorder %v454_v24, 0  ;;  %vm474_vm6 = vcmp.lt.s32.totalorder %v454_v24, 16  ;;  %vm465_vm9 = vcmp.ge.s32.totalorder %v455_v45, 0  ;;  %vm475_vm10 = vcmp.lt.s32.totalorder %v455_v45, 16  ;;  %v2217_v45 = vld [vmem:[%s3499_s3 + $0x98] sm:$0xff] }
  0x1c   : > { %s2594_s6 = scalar_lea.vmem %s3496_s0, %s1904_s27  ;;  %1109 = vmatpush.bf16.msra.mxu2 %v2219_v19  ;;  %vm2655_vm8 = vmand %vm464_vm5, %vm474_vm6  ;;  %vm466_vm13 = vcmp.ge.s32.totalorder %v456_v51, 0  ;;  %vm476_vm14 = vcmp.lt.s32.totalorder %v456_v51, 16  ;;  %1054 = vmatpush.bf16.msrb.mxu0 %v2217_v45  ;;  %v459_v51 = vadd.s32 6, %v2613_v10  ;;  %s2183_s9 = sshll.u32 (%p2568_p5), %s1761_s7, 3 }
  0x1d   : > { %v2186_v2 = vld [vmem:[%s2594_s6] sm:$0xff]  ;;  %v2187_v3 = vld [vmem:[%s2594_s6 + $0x8] sm:$0xff]  ;;  %v2188_v4 = vld [vmem:[%s2594_s6 + $0x10] sm:$0xff]  ;;  %2234 = vmatpush.bf16.msra.mxu1 %v2217_v45  ;;  %s1763_s29 = scalar_lea.vmem (%p2568_p5), %s3501_s5, %s2183_s9 }
  0x1e   : > { %1953 = vmatmul.msk.bf16.vlgmr.msra.gmra.mxu0 %vm338_vm0, %v2186_v2  ;;  %v2189_v5 = vld [vmem:[%s2594_s6 + $0x18] sm:$0xff]  ;;  %v2190_v6 = vld [vmem:[%s2594_s6 + $0x20] sm:$0xff]  ;;  %v2191_v7 = vld [vmem:[%s2594_s6 + $0x28] sm:$0xff]  ;;  %v457_v2 = vadd.s32 4, %v2613_v10 }
  0x1f   : > { %v2192_v8 = vld [vmem:[%s2594_s6 + $0x30] sm:$0xff]  ;;  %v2193_v9 = vld [vmem:[%s2594_s6 + $0x38] sm:$0xff]  ;;  %v2194_v12 = vld [vmem:[%s2594_s6 + $0x40] sm:$0xff] }
  0x20   : > { %1110 = vmatpush.bf16.msra.mxu2 %v2218_v25  ;;  %v2195_v29 = vld [vmem:[%s2594_s6 + $0x48] sm:$0xff]  ;;  %vm485_vm11 = vmand %vm465_vm9, %vm475_vm10  ;;  %vm467_vm1 = vcmp.ge.s32.totalorder %v457_v2, 0  ;;  %vm477_vm2 = vcmp.lt.s32.totalorder %v457_v2, 16  ;;  %vm469_vm10 = vcmp.ge.s32.totalorder %v459_v51, 0  ;;  %s1903_s6 = sshll.u32 %s235_s28, 6 }
  0x21   : > { %vm486_vm15 = vmand %vm466_vm13, %vm476_vm14 }
  0x2e   : > { %1954 = vmatmul.msk.bf16.gmra.mxu0 %vm338_vm0, %v2187_v3 }
  0x3e   : > { %1955 = vmatmul.msk.bf16.gmra.mxu0 %vm338_vm0, %v2188_v4 }
  0x4e   : > { %1956 = vmatmul.msk.bf16.gmra.mxu0 %vm338_vm0, %v2189_v5 }
  0x5e   : > { %1957 = vmatmul.msk.bf16.gmra.mxu0 %vm338_vm0, %v2190_v6 }
  0x6e   : > { %1958 = vmatmul.msk.bf16.gmra.mxu0 %vm338_vm0, %v2191_v7 }
  0x7e   : > { %1959 = vmatmul.msk.bf16.gmra.mxu0 %vm338_vm0, %v2192_v8 }
  0x8e   : > { %1960 = vmatmul.msk.bf16.gmra.mxu0 %vm338_vm0, %v2193_v9 }
  0x9b   : > { %v378_v14 = vpop.f32.mrf.mxu0 }
  0x9c   : > { %v379_v15 = vadd.f32 %v2618_v11, %v378_v14 }
  0x9e   : > { %v428_v16 = vmax.f32 %v379_v15, 0.0  ;;  %1961 = vmatmul.msk.bf16.gmra.mxu0 %vm338_vm0, %v2194_v12 }
  0xa0   : > { %v2631_v18 = vsel %vm483_vm3, %v428_v16, 0.0 }
  0xa1   : > { %3527 = vst [vmem:[#allocation3_spill] sm:$0xff] %v2631_v18  ;;  %v554_v22 = vrot.slane %v2631_v18, 7 }
  0xa3   : > { %v380_v20 = vpop.f32.mrf.mxu0  ;;  %v2645_v27 = vsel %vm553_vm4, 0.0, %v554_v22 }
  0xa4   : > { %v381_v21 = vadd.f32 %v2618_v11, %v380_v20  ;;  %v651_v32 = vrot.slane %v2645_v27, 2 }
  0xa6   : > { %v429_v23 = vmax.f32 %v381_v21, 0.0 }
  0xa8   : > { %v2642_v26 = vsel %vm483_vm3, %v429_v23, 0.0  ;;  %vm487_vm3 = vmand %vm467_vm1, %vm477_vm2 }
  0xa9   : > { %3528 = vst [vmem:[#allocation4_spill] sm:$0xff] %v2642_v26  ;;  %v555_v28 = vrot.slane %v2642_v26, 7  ;;  %v2210_v26 = vld [vmem:[%s3499_s3 + $0x60] sm:$0xff] }
  0xab   : > { %v383_v30 = vpop.f32.mrf.mxu0  ;;  %v2650_v31 = vsel %vm553_vm4, %v554_v22, %v555_v28  ;;  %v458_v22 = vadd.s32 5, %v2613_v10 }
  0xac   : > { %v384_v33 = vadd.f32 %v2618_v11, %v383_v30  ;;  %v652_v34 = vrot.slane %v2650_v31, 2 }
  0xad   : > { %vm468_vm5 = vcmp.ge.s32.totalorder %v458_v22, 0  ;;  %vm478_vm6 = vcmp.lt.s32.totalorder %v458_v22, 16 }
  0xae   : > { %v430_v36 = vmax.f32 %v384_v33, 0.0  ;;  %1962 = vmatmul.msk.bf16.gmra.mxu0 %vm338_vm0, %v2195_v29  ;;  %v2661_v37 = vsel %vm650_vm7, %v651_v32, %v652_v34  ;;  %vm616_vm0 = vcmp.ne.s32.totalorder %v2697_v63, 0  ;;  %vm488_vm9 = vmand %vm468_vm5, %vm478_vm6 }
  0xb0   : > { %v2665_v38 = vsel %vm2655_vm8, %v430_v36, 0.0 }
  0xb1   : > { %v557_v39 = vrot.slane %v2665_v38, 7 }
  0xb3   : > { %v2671_v40 = vsel %vm553_vm4, %v555_v28, %v557_v39  ;;  %v2673_v41 = vpop.f32.mrf.mxu0 }
  0xb4   : > { %v654_v42 = vrot.slane %v2671_v40, 2 }
  0xb6   : > { %v2679_v43 = vsel %vm650_vm7, %v652_v34, %v654_v42 }
  0xbb   : > { %v388_v44 = vpop.f32.mrf.mxu0 }
  0xbc   : > { %v389_v46 = vadd.f32 %v2618_v11, %v388_v44 }
  0xbe   : > { %v432_v48 = vmax.f32 %v389_v46, 0.0 }
  0xc0   : > { %v2685_v52 = vsel %vm485_vm11, %v432_v48, 0.0 }
  0xc3   : > { %v390_v47 = vpop.f32.mrf.mxu0 }
  0xc4   : > { %v391_v49 = vadd.f32 %v2618_v11, %v390_v47 }
  0xc6   : > { %v433_v50 = vmax.f32 %v391_v49, 0.0 }
  0xc8   : > { %v2687_v53 = vsel %vm485_vm11, %v433_v50, 0.0  ;;  %vm479_vm11 = vcmp.lt.s32.totalorder %v459_v51, 16 }
  0xc9   : > { %v918_v54 = vpack.c.bf16 %v2687_v53, %v2685_v52  ;;  %v563_v0 = vrot.slane %v2687_v53, 7  ;;  %vm489_vm13 = vmand %vm469_vm10, %vm479_vm11 }
  0xcb   : > { %v393_v55 = vpop.f32.mrf.mxu0  ;;  %2037 = vmatmul.msk.bf16.vlgmr.msra.gmra.mxu2 %vm796_vm12, %v918_v54 }
  0xcc   : > { %v394_v56 = vadd.f32 %v2618_v11, %v393_v55 }
  0xce   : > { %v434_v57 = vmax.f32 %v394_v56, 0.0 }
  0xd0   : > { %v2693_v58 = vsel %vm486_vm15, %v434_v57, 0.0 }
  0xd1   : > { %v565_v61 = vrot.slane %v2693_v58, 7 }
  0xd3   : > { %v395_v60 = vpop.f32.mrf.mxu0  ;;  %v2706_v4 = vsel %vm553_vm4, %v563_v0, %v565_v61 }
  0xd4   : > { %v396_v62 = vadd.f32 %v2618_v11, %v395_v60  ;;  %v2719_v9 = vsel %vm616_vm0, %v2706_v4, 0.0 }
  0xd6   : > { %v435_v1 = vmax.f32 %v396_v62, 0.0 }
  0xd8   : > { %v2701_v3 = vsel %vm486_vm15, %v435_v1, 0.0 }
  0xd9   : > { %v567_v5 = vrot.slane %v2701_v3, 7  ;;  %v920_v6 = vpack.c.bf16 %v2701_v3, %v2693_v58  ;;  %v2318_v20 = vpack.i.bf16 %v2701_v3, %v2693_v58 }
  0xdb   : > { %v398_v7 = vpop.f32.mrf.mxu0  ;;  %2038 = vmatmul.msk.bf16.gmra.mxu2 %vm796_vm12, %v920_v6  ;;  %v2714_v8 = vsel %vm553_vm4, %v565_v61, %v567_v5  ;;  %v2216_v6 = vld [vmem:[%s3499_s3 + $0x90] sm:$0xff] }
  0xdc   : > { %v399_v12 = vadd.f32 %v2618_v11, %v398_v7  ;;  %v2313_v13 = vpack.i.bf16 %v2714_v8, %v2719_v9  ;;  %1055 = vmatpush.bf16.msrb.mxu0 %v2216_v6  ;;  %2235 = vmatpush.bf16.msra.mxu1 %v2216_v6  ;;  %v461_v6 = vadd.s32 8, %v2613_v10 }
  0xde   : > { %v436_v14 = vmax.f32 %v399_v12, 0.0  ;;  %2314 = vrot.lane.b32.xlu0 %v2313_v13, %s2491_s30  ;;  %vm481_vm2 = vcmp.lt.s32.totalorder %v461_v6, 16 }
  0xe0   : > { %v2725_v15 = vsel %vm487_vm3, %v436_v14, 0.0 }
  0xe1   : > { %v569_v17 = vrot.slane %v2725_v15, 7 }
  0xe3   : > { %v400_v16 = vpop.f32.mrf.mxu0  ;;  %v2736_v24 = vsel %vm553_vm4, %v567_v5, %v569_v17 }
  0xe4   : > { %v401_v19 = vadd.f32 %v2618_v11, %v400_v16  ;;  %v2748_v32 = vsel %vm616_vm0, %v2736_v24, 0.0  ;;  %v386_v16 = vadd.f32 %v2618_v11, %v2673_v41 }
  0xe6   : > { %v437_v21 = vmax.f32 %v401_v19, 0.0  ;;  %2319 = vrot.lane.b32.xlu0 %v2318_v20, %s2491_s30  ;;  %v460_v19 = vadd.s32 7, %v2613_v10 }
  0xe8   : > { %v2733_v23 = vsel %vm487_vm3, %v437_v21, 0.0  ;;  %vm470_vm14 = vcmp.ge.s32.totalorder %v460_v19, 0  ;;  %vm480_vm15 = vcmp.lt.s32.totalorder %v460_v19, 16 }
  0xe9   : > { %v571_v25 = vrot.slane %v2733_v23, 7  ;;  %v922_v28 = vpack.c.bf16 %v2733_v23, %v2725_v15  ;;  %v2328_v49 = vpack.i.bf16 %v2733_v23, %v2725_v15  ;;  %vm490_vm1 = vmand %vm470_vm14, %vm480_vm15 }
  0xeb   : > { %v403_v29 = vpop.f32.mrf.mxu0  ;;  %2039 = vmatmul.msk.bf16.gmra.mxu2 %vm796_vm12, %v922_v28  ;;  %v2743_v30 = vsel %vm553_vm4, %v569_v17, %v571_v25 }
  0xec   : > { %v404_v33 = vadd.f32 %v2618_v11, %v403_v29  ;;  %v2323_v34 = vpack.i.bf16 %v2743_v30, %v2748_v32  ;;  %v431_v29 = vmax.f32 %v386_v16, 0.0 }
  0xee   : > { %v438_v36 = vmax.f32 %v404_v33, 0.0  ;;  %2324 = vrot.lane.b32.xlu1 %v2323_v34, %s2491_s30 }
  0xf0   : > { %v2754_v44 = vsel %vm488_vm9, %v438_v36, 0.0 }
  0xf1   : > { %v573_v47 = vrot.slane %v2754_v44, 7 }
  0xf3   : > { %v405_v46 = vpop.f32.mrf.mxu0  ;;  %v2768_v55 = vsel %vm553_vm4, %v571_v25, %v573_v47 }
  0xf4   : > { %v406_v48 = vadd.f32 %v2618_v11, %v405_v46  ;;  %v2780_v61 = vsel %vm616_vm0, %v2768_v55, 0.0  ;;  %v2824_v46 = vsel %vm2655_vm8, %v431_v29, 0.0  ;;  %vm471_vm8 = vcmp.ge.s32.totalorder %v461_v6, 0 }
  0xf5   : > { %3532 = vst [vmem:[#allocation6_spill] sm:$0xff] %v2824_v46  ;;  %vm2895_vm5 = vmand %vm471_vm8, %vm481_vm2 }
  0xf6   : > { %v439_v50 = vmax.f32 %v406_v48, 0.0  ;;  %2329 = vrot.lane.b32.xlu1 %v2328_v49, %s2491_s30  ;;  %v561_v48 = vrot.slane %v2685_v52, 7  ;;  %v559_v49 = vrot.slane %v2824_v46, 7 }
  0xf8   : > { %v2765_v54 = vsel %vm488_vm9, %v439_v50, 0.0 }
  0xf9   : > { %v575_v56 = vrot.slane %v2765_v54, 7  ;;  %v924_v57 = vpack.c.bf16 %v2765_v54, %v2754_v44  ;;  %v2338_v14 = vpack.i.bf16 %v2765_v54, %v2754_v44 }
  0xfb   : > { %v408_v59 = vpop.f32.mrf.mxu0  ;;  %2040 = vmatmul.msk.bf16.gmra.mxu2 %vm796_vm12, %v924_v57  ;;  %v2775_v60 = vsel %vm553_vm4, %v573_v47, %v575_v56 }
  0xfc   : > { %v409_v62 = vadd.f32 %v2618_v11, %v408_v59  ;;  %v2333_v1 = vpack.i.bf16 %v2775_v60, %v2780_v61  ;;  %v2839_v59 = vsel %vm553_vm4, %v557_v39, %v559_v49 }
  0xfd   : > { %3534 = vst [vmem:[#allocation8_spill] sm:$0xff] %v2839_v59 }
  0xfe   : > { %v440_v2 = vmax.f32 %v409_v62, 0.0  ;;  %2334 = vrot.lane.b32.xlu2 %v2333_v1, %s2491_s30 }
 0x100   : > { %v2786_v5 = vsel %vm489_vm13, %v440_v2, 0.0  ;;  %v2845_v2 = vld [vmem:[%s3499_s3 + $0x38] sm:$0xff] }
 0x101   : > { %v577_v12 = vrot.slane %v2786_v5, 7  ;;  %2242 = vmatpush.bf16.msra.mxu3 %v2845_v2 }
 0x103   : > { %v410_v7 = vpop.f32.mrf.mxu0  ;;  %v2802_v21 = vsel %vm553_vm4, %v575_v56, %v577_v12  ;;  %v2832_v56 = vsel %vm553_vm4, %v559_v49, %v561_v48 }
 0x104   : > { %v411_v13 = vadd.f32 %v2618_v11, %v410_v7  ;;  %v2817_v34 = vsel %vm616_vm0, %v2802_v21, 0.0  ;;  %v3502_v1 = vrot.slane %v2832_v56, 2 }
 0x106   : > { %v441_v17 = vmax.f32 %v411_v13, 0.0  ;;  %2339 = vrot.lane.b32.xlu2 %v2338_v14, %s2491_s30  ;;  %v656_v13 = vrot.slane %v2839_v59, 2 }
 0x108   : > { %v2799_v20 = vsel %vm489_vm13, %v441_v17, 0.0  ;;  %v2861_v17 = vadd.s32 8, %v2697_v63  ;;  %v659_v19 = vsel %vm650_vm7, %v656_v13, %v3502_v1  ;;  %v2917_v6 = vsel %vm650_vm7, %v654_v42, %v656_v13  ;;  %v2934_v42 = vld [vmem:[%s3499_s3 + $0x48] sm:$0xff] }
 0x109   : > { %3531 = vst [vmem:[#allocation5_spill] sm:$0xff] %v2799_v20  ;;  %v579_v22 = vrot.slane %v2799_v20, 7  ;;  %v2348_v25 = vpack.i.bf16 %v2799_v20, %v2786_v5  ;;  %v926_v28 = vpack.c.bf16 %v2799_v20, %v2786_v5 }
 0x10a   : > { %vm643_vm3 = vcmp.ne.s32.totalorder %v2861_v17, 15  ;;  %3541 = vst [vmem:[#allocation13_spill] sm:$0xff] %v2917_v6 }
 0x10b   : > { %v413_v41 = vpop.f32.mrf.mxu0  ;;  %2349 = vrot.lane.b32.xlu1 %v2348_v25, %s2491_s30  ;;  %2041 = vmatmul.msk.bf16.gmra.mxu2 %vm796_vm12, %v926_v28  ;;  %v2812_v33 = vsel %vm553_vm4, %v577_v12, %v579_v22  ;;  %3542 = vst [vmem:[#allocation14_spill] sm:$0xff] %v2934_v42 }
 0x10c   : > { %v414_v36 = vadd.f32 %v2618_v11, %v413_v41  ;;  %v2343_v45 = vpack.i.bf16 %v2812_v33, %v2817_v34  ;;  %v2884_v41 = vld [vmem:[%s3499_s3 + $0x58] sm:$0xff] }
 0x10d   : > { %3536 = vst [vmem:[#allocation10_spill] sm:$0xff] %v2884_v41  ;;  %2250 = vmatpush.bf16.msrb.mxu2 %v2884_v41 }
 0x10e   : > { %v442_v47 = vmax.f32 %v414_v36, 0.0  ;;  %2344 = vrot.lane.b32.xlu0 %v2343_v45, %s2491_s30 }
 0x110   : > { %v2829_v50 = vsel %vm490_vm1, %v442_v47, 0.0  ;;  %v2215_v47 = vld [vmem:[%s3499_s3 + $0x88] sm:$0xff]  ;;  %v3559_v63 = vld [vmem:[#allocation5_spill] sm:$0xff] }
 0x111   : > { %3533 = vst [vmem:[#allocation7_spill] sm:$0xff] %v2829_v50  ;;  %v581_v57 = vrot.slane %v2829_v50, 7  ;;  %1056 = vmatpush.bf16.msrb.mxu0 %v2215_v47  ;;  %2236 = vmatpush.bf16.msra.mxu1 %v2215_v47 }
 0x113   : > { %v415_v51 = vpop.f32.mrf.mxu0  ;;  %v2851_v12 = vsel %vm553_vm4, %v579_v22, %v581_v57  ;;  %v2869_v22 = vld [vmem:[%s3499_s3 + $0x30] sm:$0xff] }
 0x114   : > { %v416_v35 = vadd.f32 %v2618_v11, %v415_v51  ;;  %v2879_v29 = vsel %vm616_vm0, %v2851_v12, 0.0  ;;  %2243 = vmatpush.bf16.msra.mxu3 %v2869_v22 }
 0x116   : > { %v443_v62 = vmax.f32 %v416_v35, 0.0  ;;  %v2907_v35 = vld [vmem:[%s3499_s3 + $0x28] sm:$0xff] }
 0x118   : > { %v2848_v7 = vsel %vm490_vm1, %v443_v62, 0.0  ;;  %v2912_v62 = vld [vmem:[%s3499_s3 + $0x50] sm:$0xff]  ;;  %2244 = vmatpush.bf16.msra.mxu3 %v2907_v35 }
 0x119   : > { %3535 = vst [vmem:[#allocation9_spill] sm:$0xff] %v2848_v7  ;;  %v583_v39 = vrot.slane %v2848_v7, 7  ;;  %v2358_v14 = vpack.i.bf16 %v2848_v7, %v2829_v50  ;;  %v928_v16 = vpack.c.bf16 %v2848_v7, %v2829_v50  ;;  %2251 = vmatpush.bf16.msrb.mxu2 %v2912_v62 }
 0x11a   : > { %3540 = vst [vmem:[#allocation12_spill] sm:$0xff] %v2912_v62 }
 0x11b   : > { %v418_v25 = vpop.f32.mrf.mxu0  ;;  %2359 = vrot.lane.b32.xlu0 %v2358_v14, %s2491_s30  ;;  %2042 = vmatmul.msk.bf16.gmra.mxu2 %vm796_vm12, %v928_v16  ;;  %v2874_v28 = vsel %vm553_vm4, %v581_v57, %v583_v39  ;;  %v2902_v57 = vsel %vm643_vm3, %v659_v19, 0.0  ;;  %v2923_v14 = vld [vmem:[%s3499_s3 + $0x20] sm:$0xff] }
 0x11c   : > { %v419_v36 = vadd.f32 %v2618_v11, %v418_v25  ;;  %v2353_v45 = vpack.i.bf16 %v2874_v28, %v2879_v29  ;;  %3539 = vst [vmem:[#allocation11_spill] sm:$0xff] %v2902_v57  ;;  %v2373_v19 = vpack.i.bf16 %v2902_v57, %v2917_v6  ;;  %2245 = vmatpush.bf16.msra.mxu3 %v2923_v14  ;;  %v2970_v6 = vld [vmem:[%s3499_s3 + $0x10] sm:$0xff] }
 0x11d   : > { %2252 = vmatpush.bf16.msrb.mxu2 %v2934_v42 }
 0x11e   : > { %v444_v49 = vmax.f32 %v419_v36, 0.0  ;;  %2354 = vrot.lane.b32.xlu2 %v2353_v45, %s2491_s30  ;;  %v2941_v45 = vsel %vm553_vm4, %v561_v48, %v563_v0  ;;  %v2214_v0 = vld [vmem:[%s3499_s3 + $0x80] sm:$0xff]  ;;  %v668_v48 = vrot.slane %v2743_v30, 2 }
 0x11f   : > { %v660_v57 = vrot.slane %v2941_v45, 2  ;;  %1057 = vmatpush.bf16.msrb.mxu0 %v2214_v0  ;;  %2237 = vmatpush.bf16.msra.mxu1 %v2214_v0  ;;  %v3546_v0 = vrot.slane %v2706_v4, 2 }
 0x120   : > { %v529_v16 = vsel %vm2895_vm5, %v444_v49, 0.0  ;;  %v462_v49 = vadd.s32 9, %v2613_v10 }
 0x121   : > { %v585_v13 = vrot.slane %v529_v16, 7 }
 0x122   : > { %vm472_vm6 = vcmp.ge.s32.totalorder %v462_v49, 0  ;;  %vm482_vm9 = vcmp.lt.s32.totalorder %v462_v49, 16  ;;  %v666_v49 = vrot.slane %v2736_v24, 2 }
 0x123   : > { %v420_v25 = vpop.f32.mrf.mxu0  ;;  %2374 = vrot.lane.b32.xlu0 %v2373_v19, %s2491_s30  ;;  %v2948_v19 = vld [vmem:[%s3499_s3 + $0x18] sm:$0xff]  ;;  %v2963_v1 = vsel %vm553_vm4, %v583_v39, %v585_v13  ;;  %v2388_v39 = vpack.i.bf16 %v2687_v53, %v2685_v52  ;;  %vm3000_vm10 = vmand %vm472_vm6, %vm482_vm9 }
 0x124   : > { %v421_v36 = vadd.f32 %v2618_v11, %v420_v25  ;;  %v2953_v25 = vld [vmem:[%s3499_s3 + $0x40] sm:$0xff]  ;;  %2246 = vmatpush.bf16.msra.mxu3 %v2948_v19 }
 0x125   : > { %3543 = vst [vmem:[#allocation15_spill] sm:$0xff] %v2953_v25  ;;  %2253 = vmatpush.bf16.msrb.mxu2 %v2953_v25  ;;  %v3547_v25 = vrot.slane %v2768_v55, 2 }
 0x126   : > { %v445_v47 = vmax.f32 %v421_v36, 0.0 }
 0x127   : > { %v671_v41 = vsel %vm650_vm7, %v668_v48, %v3547_v25 }
 0x128   : > { %v530_v10 = vsel %vm2895_vm5, %v445_v47, 0.0  ;;  %2247 = vmatpush.bf16.msra.mxu3 %v2970_v6 }
 0x129   : > { %v587_v42 = vrot.slane %v530_v10, 7  ;;  %v2368_v36 = vpack.i.bf16 %v530_v10, %v529_v16  ;;  %v930_v62 = vpack.c.bf16 %v530_v10, %v529_v16  ;;  %v2984_v16 = vsel %vm616_vm0, %v2963_v1, 0.0 }
 0x12a   : > { %3545 = vst [vmem:[#allocation17_spill] sm:$0xff] %v2984_v16  ;;  %v663_v10 = vsel %vm650_vm7, %v660_v57, %v3546_v0 }
 0x12b   : > { %v423_v51 = vpop.f32.mrf.mxu0  ;;  %2369 = vrot.lane.b32.xlu2 %v2368_v36, %s2491_s30  ;;  %2043 = vmatmul.msk.bf16.gmra.mxu2 %vm796_vm12, %v930_v62  ;;  %v2979_v47 = vsel %vm553_vm4, %v585_v13, %v587_v42  ;;  %v3007_v25 = vsel %vm643_vm3, %v663_v10, 0.0  ;;  %v3552_v13 = vrot.slane %v2832_v56, 2 }
 0x12c   : > { %3544 = vst [vmem:[#allocation16_spill] sm:$0xff] %v2979_v47  ;;  %v424_v36 = vadd.f32 %v2618_v11, %v423_v51  ;;  %2389 = vrot.lane.b32.xlu0 %v2388_v39, %s2491_s30  ;;  %v2363_v62 = vpack.i.bf16 %v2979_v47, %v2984_v16  ;;  %v2213_v39 = vld [vmem:[%s3499_s3 + $0x78] sm:$0xff]  ;;  %v3015_v51 = vld [vmem:[%s3499_s3 + $0x8] sm:$0xff] }
 0x12d   : > { %3550 = vst [vmem:[#allocation18_spill] sm:$0xff] %v3007_v25  ;;  %v3028_v18 = vsel %vm650_vm7, %v3552_v13, %v660_v57  ;;  %2238 = vmatpush.bf16.msra.mxu1 %v2213_v39  ;;  %2248 = vmatpush.bf16.msra.mxu3 %v3015_v51  ;;  %v676_v13 = vrot.slane %v2812_v33, 2 }
 0x12e   : > { %v446_v0 = vmax.f32 %v424_v36, 0.0  ;;  %2364 = vrot.lane.b32.xlu1 %v2363_v62, %s2491_s30  ;;  %v3020_v36 = vsel %vm643_vm3, %v671_v41, 0.0  ;;  %3553 = vst [vmem:[#allocation20_spill] sm:$0xff] %v3028_v18  ;;  %v2383_v24 = vpack.i.bf16 %v3007_v25, %v3028_v18  ;;  %v3034_v41 = vsel %vm650_vm7, %v666_v49, %v668_v48  ;;  %v2212_v62 = vld [vmem:[%s3499_s3 + $0x70] sm:$0xff]  ;;  %1058 = vmatpush.bf16.msrb.mxu0 %v2213_v39 }
 0x12f   : > { %3551 = vst [vmem:[#allocation19_spill] sm:$0xff] %v3020_v36  ;;  %v2403_v57 = vpack.i.bf16 %v3020_v36, %v3034_v41  ;;  %v664_v25 = vrot.slane %v2714_v8, 2  ;;  %v684_v18 = vrot.slane %v2979_v47, 2  ;;  %v2378_v39 = vpack.i.bf16 %v2824_v46, %v2665_v38 }
 0x130   : > { %v531_v10 = vsel %vm3000_vm10, %v446_v0, 0.0  ;;  %3554 = vst [vmem:[#allocation21_spill] sm:$0xff] %v3034_v41  ;;  %v3042_v0 = vld [vmem:[%s3499_s3] sm:$0xff]  ;;  %v3555_v36 = vrot.slane %v2851_v12, 2 }
 0x131   : > { %v589_v7 = vrot.slane %v531_v10, 7  ;;  %2239 = vmatpush.bf16.msra.mxu1 %v2212_v62  ;;  %v667_v47 = vsel %vm650_vm7, %v664_v25, %v666_v49  ;;  %2249 = vmatpush.bf16.msra.mxu3 %v3042_v0 }
 0x132   : > { %v679_v41 = vsel %vm650_vm7, %v676_v13, %v3555_v36  ;;  %1059 = vmatpush.bf16.msrb.mxu0 %v2212_v62  ;;  %v2211_v36 = vld [vmem:[%s3499_s3 + $0x68] sm:$0xff] }
 0x133   : > { %v590_v48 = vsel %vm553_vm4, %v587_v42, %v589_v7  ;;  %v425_v50 = vpop.f32.mrf.mxu0  ;;  %2384 = vrot.lane.b32.xlu2 %v2383_v24, %s2491_s30  ;;  %v682_v42 = vrot.slane %v2963_v1, 2  ;;  %v674_v1 = vrot.slane %v2802_v21, 2  ;;  %v3074_v49 = vsel %vm643_vm3, %v679_v41, 0.0 }
 0x134   : > { %v686_v16 = vrot.slane %v590_v48, 2  ;;  %v426_v20 = vadd.f32 %v2618_v11, %v425_v50  ;;  %2404 = vrot.lane.b32.xlu0 %v2403_v57, %s2491_s30  ;;  %v3065_v11 = vsel %vm616_vm0, %v2671_v40, 0.0  ;;  %v3089_v21 = vsel %vm643_vm3, %v667_v47, 0.0 }
 0x135   : > { %v2398_v57 = vpack.i.bf16 %v2839_v59, %v3065_v11  ;;  %2240 = vmatpush.bf16.msra.mxu1 %v2211_v36 }
 0x136   : > { %v447_v24 = vmax.f32 %v426_v20, 0.0  ;;  %2379 = vrot.lane.b32.xlu1 %v2378_v39, %s2491_s30  ;;  %v687_v50 = vsel %vm650_vm7, %v684_v18, %v686_v16  ;;  %v3077_v20 = vsel %vm650_vm7, %v682_v42, %v684_v18  ;;  %v672_v18 = vrot.slane %v2775_v60, 2  ;;  %1060 = vmatpush.bf16.msrb.mxu0 %v2211_v36 }
 0x137   : > { %v3081_v62 = vsel %vm643_vm3, %v687_v50, 0.0  ;;  %v3095_v50 = vsel %vm650_vm7, %v674_v1, %v676_v13  ;;  %v3116_v36 = vsel %vm616_vm0, %v590_v48, 0.0 }
 0x138   : > { %v532_v40 = vsel %vm3000_vm10, %v447_v24, 0.0  ;;  %v2418_v47 = vpack.i.bf16 %v3074_v49, %v3095_v50  ;;  %v3556_v24 = vrot.slane %v2706_v4, 2 }
 0x139   : > { %v591_v39 = vrot.slane %v532_v40, 7  ;;  %v932_v46 = vpack.c.bf16 %v532_v40, %v531_v10  ;;  %v675_v10 = vsel %vm650_vm7, %v672_v18, %v674_v1  ;;  %2241 = vmatpush.bf16.msra.mxu1 %v2210_v26 }
 0x13a   : > { %v3105_v41 = vsel %vm650_vm7, %v3556_v24, %v664_v25  ;;  %1061 = vmatpush.bf16.msrb.mxu0 %v2210_v26  ;;  %v2428_v24 = vpack.i.bf16 %v3081_v62, %v3077_v20 }
 0x13b   : > { %v615_v59 = vsel %vm553_vm4, %v591_v39, 0.0  ;;  %2044 = vmatmul.msk.bf16.gmra.mxu2 %vm796_vm12, %v932_v46  ;;  %2399 = vrot.lane.b32.xlu2 %v2398_v57, %s2491_s30  ;;  %v3112_v13 = vsel %vm553_vm4, %v589_v7, %v591_v39  ;;  %v2393_v4 = vpack.i.bf16 %v3089_v21, %v3105_v41  ;;  %v3127_v7 = vsel %vm643_vm3, %v675_v10, 0.0 }
 0x13c   : > { %v690_v40 = vrot.slane %v615_v59, 2  ;;  %2419 = vrot.lane.b32.xlu0 %v2418_v47, %s2491_s30  ;;  %v688_v46 = vrot.slane %v3112_v13, 2  ;;  %v828_v25 = vpack.c.bf16 %v3112_v13, %v3116_v36  ;;  %v3557_v57 = vrot.slane %v2768_v55, 2 }
 0x13e   : > { %2394 = vrot.lane.b32.xlu1 %v2393_v4, %s2491_s30  ;;  %1248 = vmatpush.bf16.msra.mxu0 %v2845_v2  ;;  %v3131_v59 = vsel %vm650_vm7, %v686_v16, %v688_v46  ;;  %v691_v48 = vsel %vm650_vm7, %v688_v46, %v690_v40  ;;  %v3141_v39 = vsel %vm650_vm7, %v3557_v57, %v672_v18  ;;  %v3152_v16 = vsel %vm616_vm0, %v2832_v56, 0.0 }
 0x13f   : > { %v3136_v1 = vsel %vm643_vm3, %v691_v48, 0.0  ;;  %v2413_v2 = vpack.i.bf16 %v3127_v7, %v3141_v39  ;;  %v2408_v55 = vpack.i.bf16 %v2941_v45, %v3152_v16  ;;  %v680_v18 = vrot.slane %v2874_v28, 2 }
 0x140   : > { %v1441_v26 = vpack.c.bf16 %v3136_v1, %v3131_v59 }
 0x141   : > { %v683_v47 = vsel %vm650_vm7, %v680_v18, %v682_v42  ;;  %v3558_v42 = vrot.slane %v2851_v12, 2 }
 0x142   : > { %1249 = vmatpush.bf16.msra.mxu0 %v2869_v22  ;;  %v816_v22 = vpack.c.bf16 %v2714_v8, %v2719_v9  ;;  %v3166_v56 = vsel %vm643_vm3, %v683_v47, 0.0 }
 0x143   : > { %2414 = vrot.lane.b32.xlu2 %v2413_v2, %s2491_s30 }
 0x146   : > { %2409 = vrot.lane.b32.xlu1 %v2408_v55, %s2491_s30  ;;  %1250 = vmatpush.bf16.msra.mxu0 %v2907_v35  ;;  %v3174_v35 = vsel %vm650_vm7, %v3558_v42, %v680_v18 }
 0x147   : > { %v2423_v10 = vpack.i.bf16 %v3166_v56, %v3174_v35 }
 0x14a   : > { %1251 = vmatpush.bf16.msra.mxu0 %v2923_v14 }
 0x14b   : > { %2094 = vmatmul.msk.bf16.vlgmr.msrb.gmra.mxu2 %vm796_vm12, %v816_v22  ;;  %2429 = vrot.lane.b32.xlu2 %v2428_v24, %s2491_s30 }
 0x14e   : > { %2424 = vrot.lane.b32.xlu1 %v2423_v10, %s2491_s30  ;;  %1252 = vmatpush.bf16.msra.mxu0 %v2948_v19  ;;  %v818_v19 = vpack.c.bf16 %v2743_v30, %v2748_v32  ;;  %s3450_s30 = scalar_lea.vmem [#allocation2], %s1903_s6 }
 0x150   : > { %v2315_v40 = vpop.permute.xlu0 %2314 }
 0x151   : > { %v2317_v4 = vunpack.i.h.bf16 %v2315_v40  ;;  %v2316_v46 = vunpack.i.l.bf16 %v2315_v40 }
 0x152   : > { %1253 = vmatpush.bf16.msra.mxu0 %v2970_v6 }
 0x153   : > { %v801_v14 = vsel %vm796_vm12, %v3152_v16, %v2316_v46  ;;  %v802_v12 = vsel %vm796_vm12, %v2941_v45, %v2317_v4 }
 0x154   : > { %v817_v48 = vpack.c.bf16 %v802_v12, %v801_v14  ;;  %v820_v14 = vpack.c.bf16 %v2775_v60, %v2780_v61 }
 0x156   : > { %1266 = vmatmul.bf16.vlgmr.msra.gmra.mxu3 %v817_v48  ;;  %1254 = vmatpush.bf16.msra.mxu0 %v3015_v51 }
 0x158   : > { %v2320_v57 = vpop.permute.xlu0 %2319  ;;  %v2335_v40 = vpop.permute.xlu2 %2334 }
 0x159   : > { %v2322_v2 = vunpack.i.h.bf16 %v2320_v57  ;;  %v2321_v55 = vunpack.i.l.bf16 %v2320_v57  ;;  %v2337_v48 = vunpack.i.h.bf16 %v2335_v40  ;;  %v2336_v57 = vunpack.i.l.bf16 %v2335_v40 }
 0x15a   : > { %1255 = vmatpush.bf16.msra.mxu0 %v3042_v0 }
 0x15b   : > { %2095 = vmatmul.msk.bf16.gmra.mxu2 %vm796_vm12, %v818_v19  ;;  %v905_v6 = vsel %vm796_vm12, %v2685_v52, %v2321_v55  ;;  %v906_v18 = vsel %vm796_vm12, %v2687_v53, %v2322_v2  ;;  %v2233_v52 = vld [vmem:[%s3499_s3 + $0x118] sm:$0xff]  ;;  %v805_v55 = vsel %vm796_vm12, %v2748_v32, %v2336_v57  ;;  %v806_v19 = vsel %vm796_vm12, %v2743_v30, %v2337_v48  ;;  %v2228_v30 = vld [vmem:[%s3499_s3 + $0xf0] sm:$0xff]  ;;  %v2226_v57 = vld [vmem:[%s3499_s3 + $0xe0] sm:$0xff] }
 0x15c   : > { %v921_v47 = vpack.c.bf16 %v906_v18, %v905_v6  ;;  %1616 = vmatpush.bf16.msrb.mxu3 %v2233_v52  ;;  %v2229_v2 = vld [vmem:[%s3499_s3 + $0xf8] sm:$0xff]  ;;  %v824_v48 = vpack.c.bf16 %v2874_v28, %v2879_v29 }
 0x15d   : > { %1563 = vmatpush.bf16.msrb.mxu1 %v2229_v2 }
 0x15e   : > { %1072 = vmatmul.bf16.vlgmr.msra.gmra.mxu1 %v921_v47 }
 0x160   : > { %v2325_v22 = vpop.permute.xlu1 %2324  ;;  %v2340_v6 = vpop.permute.xlu2 %2339 }
 0x161   : > { %v2327_v51 = vunpack.i.h.bf16 %v2325_v22  ;;  %v2326_v24 = vunpack.i.l.bf16 %v2325_v22  ;;  %v2342_v18 = vunpack.i.h.bf16 %v2340_v6  ;;  %v2341_v47 = vunpack.i.l.bf16 %v2340_v6  ;;  %1564 = vmatpush.bf16.msrb.mxu1 %v2228_v30 }
 0x162   : > { %v822_v22 = vpack.c.bf16 %v2812_v33, %v2817_v34 }
 0x163   : > { %v803_v42 = vsel %vm796_vm12, %v2719_v9, %v2326_v24  ;;  %v804_v10 = vsel %vm796_vm12, %v2714_v8, %v2327_v51  ;;  %v909_v51 = vsel %vm796_vm12, %v2725_v15, %v2341_v47  ;;  %v910_v24 = vsel %vm796_vm12, %v2733_v23, %v2342_v18 }
 0x164   : > { %v819_v0 = vpack.c.bf16 %v804_v10, %v803_v42  ;;  %v925_v32 = vpack.c.bf16 %v910_v24, %v909_v51  ;;  %v2232_v10 = vld [vmem:[%s3499_s3 + $0x110] sm:$0xff]  ;;  %v2230_v24 = vld [vmem:[%s3499_s3 + $0x100] sm:$0xff] }
 0x165   : > { %1617 = vmatpush.bf16.msrb.mxu3 %v2232_v10  ;;  %v2224_v51 = vld [vmem:[%s3499_s3 + $0xd0] sm:$0xff] }
 0x166   : > { %1271 = vmatmul.bf16.gmra.mxu3 %v819_v0 }
 0x168   : > { %v2330_v4 = vpop.permute.xlu1 %2329 }
 0x169   : > { %v2332_v53 = vunpack.i.h.bf16 %v2330_v4  ;;  %v2331_v46 = vunpack.i.l.bf16 %v2330_v4 }
 0x16b   : > { %2096 = vmatmul.msk.bf16.gmra.mxu2 %vm796_vm12, %v820_v14  ;;  %v907_v9 = vsel %vm796_vm12, %v2693_v58, %v2331_v46  ;;  %v908_v8 = vsel %vm796_vm12, %v2701_v3, %v2332_v53  ;;  %v821_v58 = vpack.c.bf16 %v806_v19, %v805_v55  ;;  %v3215_v3 = vpop.f32.mrf.mxu2 }
 0x16c   : > { %v923_v12 = vpack.c.bf16 %v908_v8, %v907_v9 }
 0x16e   : > { %1077 = vmatmul.bf16.gmra.mxu1 %v923_v12  ;;  %v2227_v12 = vld [vmem:[%s3499_s3 + $0xe8] sm:$0xff] }
 0x16f   : > { %1565 = vmatpush.bf16.msrb.mxu1 %v2227_v12 }
 0x173   : > { %v3230_v40 = vpop.f32.mrf.mxu2  ;;  %1566 = vmatpush.bf16.msrb.mxu1 %v2226_v57  ;;  %v3560_v57 = vld [vmem:[#allocation16_spill] sm:$0xff] }
 0x176   : > { %1276 = vmatmul.bf16.gmra.mxu3 %v821_v58 }
 0x178   : > { %v2355_v42 = vpop.permute.xlu2 %2354 }
 0x179   : > { %v2357_v19 = vunpack.i.h.bf16 %v2355_v42  ;;  %v2356_v6 = vunpack.i.l.bf16 %v2355_v42 }
 0x17b   : > { %2097 = vmatmul.msk.bf16.gmra.mxu2 %vm796_vm12, %v822_v22  ;;  %v3251_v2 = vpop.f32.mrf.mxu2  ;;  %v809_v47 = vsel %vm796_vm12, %v2817_v34, %v2356_v6  ;;  %v810_v22 = vsel %vm796_vm12, %v2812_v33, %v2357_v19  ;;  %v2223_v33 = vld [vmem:[%s3499_s3 + $0xc8] sm:$0xff] }
 0x17c   : > { %v825_v30 = vpack.c.bf16 %v810_v22, %v809_v47 }
 0x17d   : > { %v2350_v23 = vpop.permute.xlu1 %2349 }
 0x17e   : > { %1082 = vmatmul.bf16.gmra.mxu1 %v925_v32  ;;  %v2352_v14 = vunpack.i.h.bf16 %v2350_v23  ;;  %v2351_v9 = vunpack.i.l.bf16 %v2350_v23 }
 0x180   : > { %v2345_v0 = vpop.permute.xlu0 %2344 }
 0x181   : > { %v2347_v52 = vunpack.i.h.bf16 %v2345_v0  ;;  %v2346_v15 = vunpack.i.l.bf16 %v2345_v0 }
 0x183   : > { %v807_v4 = vsel %vm796_vm12, %v2780_v61, %v2346_v15  ;;  %v808_v53 = vsel %vm796_vm12, %v2775_v60, %v2347_v52  ;;  %v911_v61 = vsel %vm796_vm12, %v2754_v44, %v2351_v9  ;;  %v912_v60 = vsel %vm796_vm12, %v2765_v54, %v2352_v14  ;;  %v2225_v44 = vld [vmem:[%s3499_s3 + $0xd8] sm:$0xff]  ;;  %v2231_v54 = vld [vmem:[%s3499_s3 + $0x108] sm:$0xff] }
 0x184   : > { %v823_v46 = vpack.c.bf16 %v808_v53, %v807_v4  ;;  %v927_v55 = vpack.c.bf16 %v912_v60, %v911_v61  ;;  %1567 = vmatpush.bf16.msrb.mxu1 %v2225_v44  ;;  %1618 = vmatpush.bf16.msrb.mxu3 %v2231_v54  ;;  %v622_v4 = vsel %vm616_vm0, %v2645_v27, 0.0  ;;  %v3277_v53 = vpop.f32.mrf.mxu2 }
 0x185   : > { %v3236_v8 = vpop.permute.xlu2 %2369 }
 0x186   : > { %1281 = vmatmul.bf16.gmra.mxu3 %v823_v46  ;;  %v713_v46 = vsel %vm643_vm3, %v2679_v43, 0.0  ;;  %v2222_v43 = vld [vmem:[%s3499_s3 + $0xc0] sm:$0xff]  ;;  %v2372_v22 = vunpack.i.h.bf16 %v3236_v8 }
 0x188   : > { %1568 = vmatpush.bf16.msrb.mxu1 %v2224_v51  ;;  %1619 = vmatpush.bf16.msrb.mxu3 %v2230_v24  ;;  %v2371_v51 = vunpack.i.l.bf16 %v3236_v8  ;;  %v3566_v8 = vld [vmem:[#allocation4_spill] sm:$0xff] }
 0x18b   : > { %2098 = vmatmul.msk.bf16.gmra.mxu2 %vm796_vm12, %v824_v48 }
 0x18c   : > { %1569 = vmatpush.bf16.msrb.mxu1 %v2223_v33  ;;  %v1122_v6 = vpop.f32.mrf.mxu2 }
 0x18d   : > { %v2360_v58 = vpop.permute.xlu0 %2359  ;;  %v3253_v18 = vpop.permute.xlu2 %2384 }
 0x18e   : > { %1087 = vmatmul.bf16.gmra.mxu1 %v927_v55  ;;  %v2362_v32 = vunpack.i.h.bf16 %v2360_v58  ;;  %v2361_v42 = vunpack.i.l.bf16 %v2360_v58 }
 0x190   : > { %v913_v27 = vsel %vm796_vm12, %v2786_v5, %v2361_v42  ;;  %v914_v60 = vsel %vm796_vm12, %v3559_v63, %v2362_v32  ;;  %1570 = vmatpush.bf16.msrb.mxu1 %v2222_v43  ;;  %v3563_v42 = vld [vmem:[#allocation7_spill] sm:$0xff]  ;;  %v3572_v63 = vld [vmem:[#allocation6_spill] sm:$0xff] }
 0x191   : > { %v3573_v43 = vld [vmem:[#allocation15_spill] sm:$0xff] }
 0x195   : > { %v2375_v10 = vpop.permute.xlu0 %2374  ;;  %v2400_v0 = vpop.permute.xlu2 %2399 }
 0x196   : > { %v2377_v52 = vunpack.i.h.bf16 %v2375_v10  ;;  %v2376_v34 = vunpack.i.l.bf16 %v2375_v10  ;;  %v2402_v15 = vunpack.i.h.bf16 %v2400_v0  ;;  %v2401_v23 = vunpack.i.l.bf16 %v2400_v0  ;;  %1286 = vmatmul.bf16.gmra.mxu3 %v825_v30  ;;  %v3564_v0 = vld [vmem:[#allocation9_spill] sm:$0xff] }
 0x197   : > { %v915_v10 = vsel %vm796_vm12, %v3563_v42, %v2371_v51 }
 0x198   : > { %v797_v14 = vsel %vm796_vm12, %v622_v4, %v2401_v23  ;;  %v798_v9 = vsel %vm796_vm12, %v2650_v31, %v2402_v15  ;;  %v1410_v12 = vsel %vm796_vm12, %v2661_v37, %v2376_v34  ;;  %v1411_v48 = vsel %vm796_vm12, %v713_v46, %v2377_v52  ;;  %v3561_v31 = vld [vmem:[#allocation17_spill] sm:$0xff]  ;;  %v1124_v34 = vpop.f32.mrf.mxu2  ;;  %v3567_v4 = vld [vmem:[#allocation10_spill] sm:$0xff] }
 0x199   : > { %v813_v61 = vpack.c.bf16 %v798_v9, %v797_v14  ;;  %v1426_v17 = vpack.c.bf16 %v1411_v48, %v1410_v12  ;;  %v3562_v55 = vpack.c.bf16 %v3560_v57, %v3561_v31  ;;  %v929_v37 = vpack.c.bf16 %v914_v60, %v913_v27  ;;  %v3568_v14 = vld [vmem:[#allocation12_spill] sm:$0xff]  ;;  %v3570_v12 = vld [vmem:[#allocation18_spill] sm:$0xff] }
 0x19a   : > { %v916_v52 = vsel %vm796_vm12, %v3564_v0, %v2372_v22  ;;  %v3569_v9 = vld [vmem:[#allocation20_spill] sm:$0xff]  ;;  %v3571_v48 = vld [vmem:[#allocation14_spill] sm:$0xff]  ;;  %v1429_v31 = vpack.c.bf16 %v3089_v21, %v3105_v41  ;;  %v3577_v22 = vld [vmem:[#allocation19_spill] sm:$0xff] }
 0x19b   : > { %2099 = vmatmul.msk.bf16.gmra.mxu2 %vm796_vm12, %v3562_v55  ;;  %v931_v33 = vpack.c.bf16 %v916_v52, %v915_v10  ;;  %v1427_v13 = vpack.c.bf16 %v3570_v12, %v3569_v9  ;;  %v2387_v55 = vunpack.i.h.bf16 %v3253_v18  ;;  %v3578_v52 = vld [vmem:[#allocation8_spill] sm:$0xff] }
 0x19e   : > { %1092 = vmatmul.bf16.gmra.mxu1 %v929_v37  ;;  %v2390_v46 = vpop.permute.xlu0 %2389  ;;  %v2386_v37 = vunpack.i.l.bf16 %v3253_v18 }
 0x19f   : > { %v2392_v36 = vunpack.i.h.bf16 %v2390_v46 }
 0x1a0   : > { %v2365_v19 = vpop.permute.xlu1 %2364  ;;  %v1127_v42 = vpop.f32.mrf.mxu2 }
 0x1a1   : > { %v2367_v58 = vunpack.i.h.bf16 %v2365_v19  ;;  %v2366_v5 = vunpack.i.l.bf16 %v2365_v19  ;;  %v904_v60 = vsel %vm796_vm12, %v3572_v63, %v2392_v36 }
 0x1a3   : > { %v811_v44 = vsel %vm796_vm12, %v2879_v29, %v2366_v5  ;;  %v812_v54 = vsel %vm796_vm12, %v2874_v28, %v2367_v58  ;;  %v3565_v28 = vld [vmem:[#allocation3_spill] sm:$0xff]  ;;  %v3574_v58 = vld [vmem:[#allocation13_spill] sm:$0xff] }
 0x1a4   : > { %v827_v47 = vpack.c.bf16 %v812_v54, %v811_v44  ;;  %v3575_v5 = vld [vmem:[#allocation11_spill] sm:$0xff] }
 0x1a5   : > { %v1413_v44 = vsel %vm796_vm12, %v3575_v5, %v2387_v55 }
 0x1a6   : > { %1291 = vmatmul.bf16.gmra.mxu3 %v827_v47  ;;  %v3576_v47 = vld [vmem:[#allocation21_spill] sm:$0xff] }
 0x1a7   : > { %v1431_v51 = vpack.c.bf16 %v3577_v22, %v3576_v47 }
 0x1a8   : > { %v2380_v24 = vpop.permute.xlu1 %2379 }
 0x1a9   : > { %v2382_v30 = vunpack.i.h.bf16 %v2380_v24  ;;  %v2381_v32 = vunpack.i.l.bf16 %v2380_v24 }
 0x1ab   : > { %2100 = vmatmul.msk.bf16.gmra.mxu2 %vm796_vm12, %v828_v25  ;;  %v901_v29 = vsel %vm796_vm12, %v3565_v28, %v2381_v32  ;;  %v902_v15 = vsel %vm796_vm12, %v3566_v8, %v2382_v30  ;;  %v2391_v25 = vunpack.i.l.bf16 %v2390_v46 }
 0x1ac   : > { %v917_v23 = vpack.c.bf16 %v902_v15, %v901_v29 }
 0x1ad   : > { %v903_v27 = vsel %vm796_vm12, %v2665_v38, %v2391_v25  ;;  %v1412_v38 = vsel %vm796_vm12, %v3574_v58, %v2386_v37  ;;  %v1433_v25 = vpack.c.bf16 %v3127_v7, %v3141_v39 }
 0x1ae   : > { %1062 = vmatmul.bf16.vlgmr.msrb.gmra.mxu0 %v917_v23  ;;  %1097 = vmatmul.bf16.gmra.mxu1 %v931_v33  ;;  %v919_v57 = vpack.c.bf16 %v904_v60, %v903_v27  ;;  %v1428_v54 = vpack.c.bf16 %v1413_v44, %v1412_v38 }
 0x1af   : > { %1301 = vmatpush.bf16.msrb.mxu0 %v3567_v4 }
 0x1b0   : > { %v2395_v19 = vpop.permute.xlu1 %2394 }
 0x1b1   : > { %v2397_v24 = vunpack.i.h.bf16 %v2395_v19  ;;  %v2396_v30 = vunpack.i.l.bf16 %v2395_v19  ;;  %v2415_v19 = vpop.permute.xlu2 %2414 }
 0x1b2   : > { %v2416_v5 = vunpack.i.l.bf16 %v2415_v19 }
 0x1b3   : > { %1302 = vmatpush.bf16.msrb.mxu0 %v3568_v14  ;;  %v1415_v29 = vsel %vm796_vm12, %v3570_v12, %v2397_v24  ;;  %v1129_v14 = vpop.f32.mrf.mxu2 }
 0x1b6   : > { %2173 = vmatmul.msk.bf16.vlgmr.msrb.gmra.mxu3 %vm796_vm12, %v1427_v13 }
 0x1b7   : > { %1303 = vmatpush.bf16.msrb.mxu0 %v3571_v48 }
 0x1bb   : > { %1304 = vmatpush.bf16.msrb.mxu0 %v3573_v43  ;;  %v1132_v43 = vpop.f32.mrf.mxu2 }
 0x1be   : > { %1067 = vmatmul.bf16.gmra.mxu0 %v919_v57  ;;  %1571 = vmatmul.bf16.vlgmr.msrb.gmra.mxu1 %v1426_v17  ;;  %v2410_v17 = vpop.permute.xlu1 %2409 }
 0x1bf   : > { %v2412_v32 = vunpack.i.h.bf16 %v2410_v17  ;;  %v2411_v18 = vunpack.i.l.bf16 %v2410_v17 }
 0x1c1   : > { %v799_v0 = vsel %vm796_vm12, %v3065_v11, %v2411_v18  ;;  %v800_v28 = vsel %vm796_vm12, %v3578_v52, %v2412_v32  ;;  %v2405_v11 = vpop.permute.xlu0 %2404 }
 0x1c2   : > { %v815_v23 = vpack.c.bf16 %v800_v28, %v799_v0  ;;  %v2406_v48 = vunpack.i.l.bf16 %v2405_v11  ;;  %v1437_v28 = vpack.c.bf16 %v3166_v56, %v3174_v35 }
 0x1c3   : > { %v1134_v44 = vpop.f32.mrf.mxu2 }
 0x1c4   : > { %v1416_v12 = vsel %vm796_vm12, %v3105_v41, %v2406_v48  ;;  %v1435_v41 = vpack.c.bf16 %v3074_v49, %v3095_v50 }
 0x1c6   : > { %2174 = vmatmul.msk.bf16.gmra.mxu3 %vm796_vm12, %v1429_v31 }
 0x1cb   : > { %v1137_v18 = vpop.f32.mrf.mxu2 }
 0x1ce   : > { %1256 = vmatmul.bf16.vlgmr.msra.gmra.mxu0 %v813_v61  ;;  %1576 = vmatmul.bf16.gmra.mxu1 %v1428_v54  ;;  %v1414_v61 = vsel %vm796_vm12, %v3569_v9, %v2396_v30  ;;  %v2407_v9 = vunpack.i.h.bf16 %v2405_v11 }
 0x1cf   : > { %v1430_v33 = vpack.c.bf16 %v1415_v29, %v1414_v61 }
 0x1d0   : > { %v1417_v63 = vsel %vm796_vm12, %v3089_v21, %v2407_v9  ;;  %v2417_v21 = vunpack.i.h.bf16 %v2415_v19 }
 0x1d1   : > { %v1432_v31 = vpack.c.bf16 %v1417_v63, %v1416_v12 }
 0x1d2   : > { %v1419_v17 = vsel %vm796_vm12, %v3577_v22, %v2417_v21 }
 0x1d6   : > { %2175 = vmatmul.msk.bf16.gmra.mxu3 %vm796_vm12, %v1431_v51 }
 0x1d9   : > { %v1267_v10 = vpop.f32.mrf.mxu3 }
 0x1db   : > { %v1073_v8 = vpop.f32.mrf.mxu1 }
 0x1dc   : > { %v1123_v15 = vadd.f32 %v1122_v6, %v1073_v8 }
 0x1de   : > { %1261 = vmatmul.bf16.gmra.mxu0 %v815_v23  ;;  %v3348_v4 = vadd.f32 %v1267_v10, %v1123_v15  ;;  %1581 = vmatmul.bf16.gmra.mxu1 %v1430_v33  ;;  %v2420_v10 = vpop.permute.xlu0 %2419  ;;  %v1139_v23 = vpop.f32.mrf.mxu2 }
 0x1df   : > { %v2422_v61 = vunpack.i.h.bf16 %v2420_v10  ;;  %v2421_v29 = vunpack.i.l.bf16 %v2420_v10 }
 0x1e1   : > { %v1269_v46 = vpop.f32.mrf.mxu3  ;;  %v1420_v8 = vsel %vm796_vm12, %v3141_v39, %v2421_v29  ;;  %v1421_v15 = vsel %vm796_vm12, %v3127_v7, %v2422_v61  ;;  %v3579_v39 = vpack.c.bf16 %v3081_v62, %v3077_v20 }
 0x1e3   : > { %v1075_v13 = vpop.f32.mrf.mxu1 }
 0x1e4   : > { %v1125_v36 = vadd.f32 %v1124_v34, %v1075_v13  ;;  %v814_v34 = vpack.c.bf16 %v2941_v45, %v3152_v16  ;;  %v1418_v16 = vsel %vm796_vm12, %v3576_v47, %v2416_v5 }
 0x1e5   : > { %v1434_v30 = vpack.c.bf16 %v1419_v17, %v1418_v16 }
 0x1e6   : > { %v3352_v27 = vadd.f32 %v1269_v46, %v1125_v36  ;;  %2176 = vmatmul.msk.bf16.gmra.mxu3 %vm796_vm12, %v1433_v25  ;;  %v2425_v36 = vpop.permute.xlu1 %2424  ;;  %v1142_v9 = vpop.f32.mrf.mxu2 }
 0x1e7   : > { %v2426_v12 = vunpack.i.l.bf16 %v2425_v36 }
 0x1e9   : > { %v1272_v6 = vpop.f32.mrf.mxu3 }
 0x1eb   : > { %v1078_v60 = vpop.f32.mrf.mxu1 }
 0x1ec   : > { %v1128_v57 = vadd.f32 %v1127_v42, %v1078_v60  ;;  %v1422_v60 = vsel %vm796_vm12, %v3095_v50, %v2426_v12 }
 0x1ee   : > { %2093 = vmatmul.msk.bf16.vlgmr.msrb.gmra.mxu0 %vm796_vm12, %v814_v34  ;;  %v3362_v55 = vadd.f32 %v1272_v6, %v1128_v57  ;;  %1586 = vmatmul.bf16.gmra.mxu1 %v1432_v31  ;;  %v2427_v6 = vunpack.i.h.bf16 %v2425_v36 }
 0x1f0   : > { %v1423_v34 = vsel %vm796_vm12, %v3074_v49, %v2427_v6 }
 0x1f1   : > { %v1274_v37 = vpop.f32.mrf.mxu3  ;;  %v1438_v31 = vpack.c.bf16 %v1423_v34, %v1422_v60  ;;  %v3416_v60 = vld [vmem:[%s3500_s4] ss:$0 sm:$0xff] }
 0x1f3   : > { %v1080_v58 = vpop.f32.mrf.mxu1 }
 0x1f4   : > { %v1130_v38 = vadd.f32 %v1129_v14, %v1080_v58  ;;  %v1436_v14 = vpack.c.bf16 %v1421_v15, %v1420_v8 }
 0x1f6   : > { %v3366_v54 = vadd.f32 %v1274_v37, %v1130_v38  ;;  %2177 = vmatmul.msk.bf16.gmra.mxu3 %vm796_vm12, %v1435_v41  ;;  %v1144_v37 = vpop.f32.mrf.mxu2  ;;  %v2430_v38 = vpop.permute.xlu2 %2429 }
 0x1f7   : > { %v2432_v62 = vunpack.i.h.bf16 %v2430_v38  ;;  %v2431_v21 = vunpack.i.l.bf16 %v2430_v38 }
 0x1f9   : > { %v1277_v45 = vpop.f32.mrf.mxu3  ;;  %v1424_v50 = vsel %vm796_vm12, %v3174_v35, %v2431_v21 }
 0x1fb   : > { %v1083_v51 = vpop.f32.mrf.mxu1 }
 0x1fc   : > { %v1133_v24 = vadd.f32 %v1132_v43, %v1083_v51 }
 0x1fe   : > { %v3373_v32 = vadd.f32 %v1277_v45, %v1133_v24  ;;  %1591 = vmatmul.bf16.gmra.mxu1 %v1434_v30  ;;  %v1147_v49 = vpop.f32.mrf.mxu2 }
 0x201   : > { %v1279_v42 = vpop.f32.mrf.mxu3 }
 0x203   : > { %v1085_v0 = vpop.f32.mrf.mxu1 }
 0x204   : > { %v1135_v52 = vadd.f32 %v1134_v44, %v1085_v0  ;;  %v1425_v44 = vsel %vm796_vm12, %v3166_v56, %v2432_v62 }
 0x205   : > { %v1440_v24 = vpack.c.bf16 %v1425_v44, %v1424_v50 }
 0x206   : > { %v3377_v47 = vadd.f32 %v1279_v42, %v1135_v52  ;;  %2178 = vmatmul.msk.bf16.gmra.mxu3 %vm796_vm12, %v1437_v28 }
 0x209   : > { %v1282_v22 = vpop.f32.mrf.mxu3 }
 0x20b   : > { %v1088_v33 = vpop.f32.mrf.mxu1 }
 0x20c   : > { %v1138_v46 = vadd.f32 %v1137_v18, %v1088_v33  ;;  %v1149_v18 = vpop.f32.mrf.mxu2 }
 0x20e   : > { %v3384_v11 = vadd.f32 %v1282_v22, %v1138_v46  ;;  %1596 = vmatmul.bf16.gmra.mxu1 %v1436_v14 }
 0x211   : > { %v1284_v13 = vpop.f32.mrf.mxu3 }
 0x213   : > { %v1090_v25 = vpop.f32.mrf.mxu1 }
 0x214   : > { %v1140_v48 = vadd.f32 %v1139_v23, %v1090_v25  ;;  %v1311_v15 = vpop.f32.mrf.mxu2 }
 0x216   : > { %v3386_v63 = vadd.f32 %v1284_v13, %v1140_v48  ;;  %2179 = vmatmul.msk.bf16.gmra.mxu3 %vm796_vm12, %v3579_v39 }
 0x219   : > { %v1287_v7 = vpop.f32.mrf.mxu3 }
 0x21b   : > { %v1093_v43 = vpop.f32.mrf.mxu1 }
 0x21c   : > { %v1143_v57 = vadd.f32 %v1142_v9, %v1093_v43  ;;  %v1313_v13 = vpop.f32.mrf.mxu2 }
 0x21e   : > { %v3396_v19 = vadd.f32 %v1287_v7, %v1143_v57  ;;  %1601 = vmatmul.bf16.gmra.mxu1 %v1438_v31 }
 0x221   : > { %v1289_v58 = vpop.f32.mrf.mxu3 }
 0x223   : > { %v1095_v41 = vpop.f32.mrf.mxu1 }
 0x224   : > { %v1145_v20 = vadd.f32 %v1144_v37, %v1095_v41  ;;  %v1316_v34 = vpop.f32.mrf.mxu2 }
 0x226   : > { %v3398_v5 = vadd.f32 %v1289_v58, %v1145_v20  ;;  %2180 = vmatmul.msk.bf16.gmra.mxu3 %vm796_vm12, %v1441_v26 }
 0x229   : > { %v1292_v45 = vpop.f32.mrf.mxu3 }
 0x22b   : > { %v1063_v16 = vpop.f32.mrf.mxu0  ;;  %v1098_v17 = vpop.f32.mrf.mxu1 }
 0x22c   : > { %v1148_v51 = vadd.f32 %v1147_v49, %v1098_v17  ;;  %v1113_v25 = vadd.f32 %v3215_v3, %v1063_v16 }
 0x22e   : > { %v3408_v30 = vadd.f32 %v1292_v45, %v1148_v51  ;;  %1606 = vmatmul.bf16.gmra.mxu1 %v1440_v24 }
 0x231   : > { %v1294_v26 = vpop.f32.mrf.mxu3 }
 0x233   : > { %v1065_v42 = vpop.f32.mrf.mxu0  ;;  %v1100_v59 = vpop.f32.mrf.mxu1 }
 0x234   : > { %v1150_v1 = vadd.f32 %v1149_v18, %v1100_v59  ;;  %v1115_v57 = vadd.f32 %v3230_v40, %v1065_v42  ;;  %v1318_v40 = vpop.f32.mrf.mxu2 }
 0x236   : > { %v3410_v10 = vadd.f32 %v1294_v26, %v1150_v1 }
 0x239   : > { %v1621_v28 = vpop.f32.mrf.mxu3 }
 0x23b   : > { %v1068_v0 = vpop.f32.mrf.mxu0  ;;  %v1572_v52 = vpop.f32.mrf.mxu1 }
 0x23c   : > { %v1622_v6 = vadd.f32 %v1621_v28, %v1572_v52  ;;  %v1118_v31 = vadd.f32 %v3251_v2, %v1068_v0  ;;  %v1321_v52 = vpop.f32.mrf.mxu2 }
 0x241   : > { %v1623_v29 = vpop.f32.mrf.mxu3 }
 0x243   : > { %v1070_v35 = vpop.f32.mrf.mxu0  ;;  %v1574_v61 = vpop.f32.mrf.mxu1 }
 0x244   : > { %v1624_v20 = vadd.f32 %v1623_v29, %v1574_v61  ;;  %v1120_v44 = vadd.f32 %v3277_v53, %v1070_v35 }
 0x249   : > { %v1626_v23 = vpop.f32.mrf.mxu3 }
 0x24b   : > { %v1257_v56 = vpop.f32.mrf.mxu0  ;;  %v1577_v8 = vpop.f32.mrf.mxu1 }
 0x24c   : > { %v1258_v9 = vadd.f32 %v1257_v56, %v1113_v25  ;;  %v1627_v45 = vadd.f32 %v1626_v23, %v1577_v8  ;;  %v1317_v56 = vadd.f32 %v1316_v34, %v3348_v4  ;;  %v1323_v8 = vpop.f32.mrf.mxu2 }
 0x251   : > { %v1628_v36 = vpop.f32.mrf.mxu3 }
 0x253   : > { %v1259_v22 = vpop.f32.mrf.mxu0  ;;  %v1579_v46 = vpop.f32.mrf.mxu1 }
 0x254   : > { %v1260_v3 = vadd.f32 %v1259_v22, %v1115_v57  ;;  %v1629_v59 = vadd.f32 %v1628_v36, %v1579_v46  ;;  %v1319_v46 = vadd.f32 %v1318_v40, %v3352_v27  ;;  %v1324_v27 = vadd.f32 %v1323_v8, %v3366_v54 }
 0x259   : > { %v1631_v43 = vpop.f32.mrf.mxu3 }
 0x25b   : > { %v1262_v33 = vpop.f32.mrf.mxu0  ;;  %v1582_v39 = vpop.f32.mrf.mxu1 }
 0x25c   : > { %v1263_v58 = vadd.f32 %v1262_v33, %v1118_v31  ;;  %v1632_v53 = vadd.f32 %v1631_v43, %v1582_v39 }
 0x25e   : > { %v1312_v21 = vadd.f32 %v1311_v15, %v1263_v58  ;;  %v1665_v61 = vadd.f32 %v1632_v53, %v1317_v56 }
 0x260   : > { %v1663_v2 = vadd.f32 %v1627_v45, %v1312_v21  ;;  %v1685_v33 = vadd.f32 %v3416_v60, %v1665_v61 }
 0x261   : > { %v1633_v17 = vpop.f32.mrf.mxu3 }
 0x262   : > { %v1683_v42 = vadd.f32 %v3416_v60, %v1663_v2 }
 0x263   : > { %v1264_v14 = vpop.f32.mrf.mxu0  ;;  %v1584_v50 = vpop.f32.mrf.mxu1 }
 0x264   : > { %v1265_v51 = vadd.f32 %v1264_v14, %v1120_v44  ;;  %v1699_v0 = vmax.f32 %v1683_v42, 0.0  ;;  %v1634_v23 = vadd.f32 %v1633_v17, %v1584_v50 }
 0x266   : > { %v1314_v18 = vadd.f32 %v1313_v13, %v1265_v51  ;;  %v1666_v14 = vadd.f32 %v1634_v23, %v1319_v46  ;;  %v1701_v13 = vmax.f32 %v1685_v33, 0.0 }
 0x268   : > { %v1664_v26 = vadd.f32 %v1629_v59, %v1314_v18 }
 0x269   : > { %v1636_v28 = vpop.f32.mrf.mxu3 }
 0x26a   : > { %v1684_v35 = vadd.f32 %v3416_v60, %v1664_v26 }
 0x26b   : > { %v1306_v48 = vpop.f32.mrf.mxu0  ;;  %v1587_v1 = vpop.f32.mrf.mxu1 }
 0x26c   : > { %v1307_v12 = vadd.f32 %v1306_v48, %v1258_v9  ;;  %v1700_v29 = vmax.f32 %v1684_v35, 0.0  ;;  %v1637_v25 = vadd.f32 %v1636_v28, %v1587_v1  ;;  %v1686_v9 = vadd.f32 %v3416_v60, %v1666_v14  ;;  %v1326_v48 = vpop.f32.mrf.mxu2 }
 0x26e   : > { %v1661_v7 = vadd.f32 %v1622_v6, %v1307_v12  ;;  %v1322_v6 = vadd.f32 %v1321_v52, %v3362_v55  ;;  %v1702_v39 = vmax.f32 %v1686_v9, 0.0 }
 0x270   : > { %v1681_v37 = vadd.f32 %v3416_v60, %v1661_v7  ;;  %v1667_v12 = vadd.f32 %v1637_v25, %v1322_v6 }
 0x271   : > { %v1638_v15 = vpop.f32.mrf.mxu3 }
 0x272   : > { %v1697_v38 = vmax.f32 %v1681_v37, 0.0  ;;  %v1687_v34 = vadd.f32 %v3416_v60, %v1667_v12 }
 0x273   : > { %v1308_v41 = vpop.f32.mrf.mxu0  ;;  %v1589_v22 = vpop.f32.mrf.mxu1 }
 0x274   : > { %v1309_v62 = vadd.f32 %v1308_v41, %v1260_v3  ;;  %1713 = vxpose.xlu0.b32.start [1/16] (narrow) %v1697_v38, 64  ;;  %v1639_v7 = vadd.f32 %v1638_v15, %v1589_v22  ;;  %v1328_v57 = vpop.f32.mrf.mxu2  ;;  %v1703_v3 = vmax.f32 %v1687_v34, 0.0  ;;  %v1327_v41 = vadd.f32 %v1326_v48, %v3373_v32 }
 0x275   : > { %v1329_v54 = vadd.f32 %v1328_v57, %v3377_v47 }
 0x276   : > { %v1662_v49 = vadd.f32 %v1624_v20, %v1309_v62  ;;  %v1668_v37 = vadd.f32 %v1639_v7, %v1324_v27 }
 0x278   : > { %v1682_v16 = vadd.f32 %v3416_v60, %v1662_v49  ;;  %v1688_v38 = vadd.f32 %v3416_v60, %v1668_v37 }
 0x279   : > { %v1641_v4 = vpop.f32.mrf.mxu3 }
 0x27a   : > { %v1698_v24 = vmax.f32 %v1682_v16, 0.0  ;;  %v1704_v62 = vmax.f32 %v1688_v38, 0.0 }
 0x27b   : > { %v1592_v36 = vpop.f32.mrf.mxu1 }
 0x27c   : > { %1714 = vxpose.xlu0.b32.cont [2/16] (narrow) %v1698_v24, 64  ;;  %v1642_v58 = vadd.f32 %v1641_v4, %v1592_v36  ;;  %v1331_v21 = vpop.f32.mrf.mxu2 }
 0x27d   : > { %v1332_v24 = vadd.f32 %v1331_v21, %v3384_v11 }
 0x27e   : > { %v1669_v20 = vadd.f32 %v1642_v58, %v1327_v41 }
 0x280   : > { %v1689_v44 = vadd.f32 %v3416_v60, %v1669_v20 }
 0x281   : > { %v1643_v31 = vpop.f32.mrf.mxu3 }
 0x282   : > { %v1705_v16 = vmax.f32 %v1689_v44, 0.0 }
 0x283   : > { %v1594_v43 = vpop.f32.mrf.mxu1 }
 0x284   : > { %1715 = vxpose.xlu0.b32.cont [3/16] (narrow) %v1699_v0, 64  ;;  %v1644_v50 = vadd.f32 %v1643_v31, %v1594_v43  ;;  %v1333_v17 = vpop.f32.mrf.mxu2 }
 0x285   : > { %v1334_v52 = vadd.f32 %v1333_v17, %v3386_v63 }
 0x286   : > { %v1670_v45 = vadd.f32 %v1644_v50, %v1329_v54 }
 0x288   : > { %v1690_v32 = vadd.f32 %v3416_v60, %v1670_v45 }
 0x289   : > { %v1646_v49 = vpop.f32.mrf.mxu3 }
 0x28a   : > { %v1706_v42 = vmax.f32 %v1690_v32, 0.0 }
 0x28b   : > { %v1597_v55 = vpop.f32.mrf.mxu1 }
 0x28c   : > { %1716 = vxpose.xlu0.b32.cont [4/16] (narrow) %v1700_v29, 64  ;;  %v1647_v51 = vadd.f32 %v1646_v49, %v1597_v55  ;;  %v1336_v0 = vpop.f32.mrf.mxu2 }
 0x28d   : > { %v1337_v11 = vadd.f32 %v1336_v0, %v3396_v19 }
 0x28e   : > { %v1671_v18 = vadd.f32 %v1647_v51, %v1332_v24 }
 0x290   : > { %v1691_v26 = vadd.f32 %v3416_v60, %v1671_v18 }
 0x291   : > { %v1648_v2 = vpop.f32.mrf.mxu3 }
 0x292   : > { %v1707_v53 = vmax.f32 %v1691_v26, 0.0 }
 0x293   : > { %v1599_v40 = vpop.f32.mrf.mxu1 }
 0x294   : > { %1717 = vxpose.xlu0.b32.cont [5/16] (narrow) %v1701_v13, 64  ;;  %v1649_v1 = vadd.f32 %v1648_v2, %v1599_v40  ;;  %v1338_v29 = vpop.f32.mrf.mxu2 }
 0x295   : > { %v1339_v46 = vadd.f32 %v1338_v29, %v3398_v5 }
 0x296   : > { %v1672_v28 = vadd.f32 %v1649_v1, %v1334_v52 }
 0x298   : > { %v1692_v56 = vadd.f32 %v3416_v60, %v1672_v28 }
 0x299   : > { %v1651_v47 = vpop.f32.mrf.mxu3 }
 0x29a   : > { %v1708_v15 = vmax.f32 %v1692_v56, 0.0 }
 0x29b   : > { %v1602_v59 = vpop.f32.mrf.mxu1 }
 0x29c   : > { %1718 = vxpose.xlu0.b32.cont [6/16] (narrow) %v1702_v39, 64  ;;  %v1652_v35 = vadd.f32 %v1651_v47, %v1602_v59  ;;  %v1341_v36 = vpop.f32.mrf.mxu2 }
 0x29d   : > { %v1342_v19 = vadd.f32 %v1341_v36, %v3408_v30 }
 0x29e   : > { %v1673_v8 = vadd.f32 %v1652_v35, %v1337_v11 }
 0x2a0   : > { %v1693_v33 = vadd.f32 %v3416_v60, %v1673_v8 }
 0x2a1   : > { %v1653_v22 = vpop.f32.mrf.mxu3 }
 0x2a2   : > { %v1709_v13 = vmax.f32 %v1693_v33, 0.0 }
 0x2a3   : > { %v1604_v61 = vpop.f32.mrf.mxu1 }
 0x2a4   : > { %1719 = vxpose.xlu0.b32.cont [7/16] (narrow) %v1703_v3, 64  ;;  %v1654_v23 = vadd.f32 %v1653_v22, %v1604_v61  ;;  %v1343_v39 = vpop.f32.mrf.mxu2 }
 0x2a5   : > { %v1344_v43 = vadd.f32 %v1343_v39, %v3410_v10 }
 0x2a6   : > { %v1674_v14 = vadd.f32 %v1654_v23, %v1339_v46 }
 0x2a8   : > { %v1694_v48 = vadd.f32 %v3416_v60, %v1674_v14 }
 0x2a9   : > { %v1656_v25 = vpop.f32.mrf.mxu3 }
 0x2aa   : > { %v1710_v6 = vmax.f32 %v1694_v48, 0.0 }
 0x2ab   : > { %v1607_v63 = vpop.f32.mrf.mxu1 }
 0x2ac   : > { %1720 = vxpose.xlu0.b32.cont [8/16] (narrow) %v1704_v62, 64  ;;  %v1657_v9 = vadd.f32 %v1656_v25, %v1607_v63 }
 0x2ae   : > { %v1675_v4 = vadd.f32 %v1657_v9, %v1342_v19 }
 0x2b0   : > { %v1695_v5 = vadd.f32 %v3416_v60, %v1675_v4 }
 0x2b1   : > { %v1658_v7 = vpop.f32.mrf.mxu3 }
 0x2b2   : > { %v1711_v57 = vmax.f32 %v1695_v5, 0.0 }
 0x2b3   : > { %v1609_v12 = vpop.f32.mrf.mxu1 }
 0x2b4   : > { %1721 = vxpose.xlu0.b32.cont [9/16] (narrow) %v1705_v16, 64  ;;  %v1659_v34 = vadd.f32 %v1658_v7, %v1609_v12 }
 0x2b6   : > { %v1676_v27 = vadd.f32 %v1659_v34, %v1344_v43 }
 0x2b8   : > { %v1696_v31 = vadd.f32 %v3416_v60, %v1676_v27 }
 0x2ba   : > { %v1712_v37 = vmax.f32 %v1696_v31, 0.0 }
 0x2bc   : > { %1722 = vxpose.xlu0.b32.cont [10/16] (narrow) %v1706_v42, 64 }
 0x2c4   : > { %1723 = vxpose.xlu0.b32.cont [11/16] (narrow) %v1707_v53, 64 }
 0x2cc   : > { %1724 = vxpose.xlu0.b32.cont [12/16] (narrow) %v1708_v15, 64 }
 0x2d4   : > { %1725 = vxpose.xlu0.b32.cont [13/16] (narrow) %v1709_v13, 64 }
 0x2dc   : > { %1726 = vxpose.xlu0.b32.cont [14/16] (narrow) %v1710_v6, 64 }
 0x2e4   : > { %1727 = vxpose.xlu0.b32.cont [15/16] (narrow) %v1711_v57, 64 }
 0x2ec   : > { %1728 = vxpose.xlu0.b32.end [16/16] (narrow) %v1712_v37, 64 }
 0x318   : > { %v1729_v30 = vpop.trf.xlu0 }
 0x319   : > { %1745 = vst [vmem:[%s3450_s30] sm:$0xff] %v1729_v30 }
 0x320   : > { %v1730_v10 = vpop.trf.xlu0  ;;  %v1806_v20 = vld [vmem:[%s3450_s30] sm:$0xff] (%p2568_p5) }
 0x321   : > { %1746 = vst [vmem:[%s3450_s30 + $0x8] sm:$0xff] %v1730_v10 }
 0x322   : > { %1807 = vst [vmem:[%s1763_s29] sm:$0xff] (%p2568_p5), %v1806_v20 }
 0x328   : > { %v1731_v3 = vpop.trf.xlu0  ;;  %v1808_v62 = vld [vmem:[%s3450_s30 + $0x8] sm:$0xff] (%p2568_p5) }
 0x329   : > { %1747 = vst [vmem:[%s3450_s30 + $0x10] sm:$0xff] %v1731_v3 }
 0x32a   : > { %1809 = vst [vmem:[%s1763_s29 + $0x10] sm:$0xff] (%p2568_p5), %v1808_v62 }
 0x330   : > { %v1732_v60 = vpop.trf.xlu0  ;;  %v1810_v21 = vld [vmem:[%s3450_s30 + $0x10] sm:$0xff] (%p2568_p5) }
 0x331   : > { %1748 = vst [vmem:[%s3450_s30 + $0x18] sm:$0xff] %v1732_v60 }
 0x332   : > { %1811 = vst [vmem:[%s1763_s29 + $0x20] sm:$0xff] (%p2568_p5), %v1810_v21 }
 0x338   : > { %v1733_v58 = vpop.trf.xlu0  ;;  %v1812_v49 = vld [vmem:[%s3450_s30 + $0x18] sm:$0xff] (%p2568_p5) }
 0x339   : > { %1749 = vst [vmem:[%s3450_s30 + $0x20] sm:$0xff] %v1733_v58 }
 0x33a   : > { %1813 = vst [vmem:[%s1763_s29 + $0x30] sm:$0xff] (%p2568_p5), %v1812_v49 }
 0x340   : > { %v1734_v38 = vpop.trf.xlu0  ;;  %v1814_v50 = vld [vmem:[%s3450_s30 + $0x20] sm:$0xff] (%p2568_p5) }
 0x341   : > { %1750 = vst [vmem:[%s3450_s30 + $0x28] sm:$0xff] %v1734_v38 }
 0x342   : > { %1815 = vst [vmem:[%s1763_s29 + $0x40] sm:$0xff] (%p2568_p5), %v1814_v50 }
 0x348   : > { %v1735_v41 = vpop.trf.xlu0  ;;  %v1816_v44 = vld [vmem:[%s3450_s30 + $0x28] sm:$0xff] (%p2568_p5) }
 0x349   : > { %1751 = vst [vmem:[%s3450_s30 + $0x30] sm:$0xff] %v1735_v41 }
 0x34a   : > { %1817 = vst [vmem:[%s1763_s29 + $0x50] sm:$0xff] (%p2568_p5), %v1816_v44 }
 0x34d   : > { %1759 = sbr.rel (!%p2568_p5) target bundleno = 858 (0x35a), region = 44 }
 0x350   : > { %v1736_v55 = vpop.trf.xlu0  ;;  %v1818_v54 = vld [vmem:[%s3450_s30 + $0x30] sm:$0xff] (%p2568_p5) }
 0x351   : > { %1752 = vst [vmem:[%s3450_s30 + $0x38] sm:$0xff] %v1736_v55 }
 0x352   : > { %1819 = vst [vmem:[%s1763_s29 + $0x60] sm:$0xff] %v1818_v54 }
 0x358   : > { %v1820_v45 = vld [vmem:[%s3450_s30 + $0x38] sm:$0xff] }
 0x359   : > { %1821 = vst [vmem:[%s1763_s29 + $0x70] sm:$0xff] %v1820_v45 }
 0x35a PF: > { %s15_s24 = sadd.s32 1, %s2489_s24   ;;  %s3580_s18 = smov %s2469_s19 }
 0x35b   : > { %p12_p11 = scmp.ge.s32.totalorder %s15_s24, 6   ;;  %s3581_s19 = smov %s2579_s8 }
 0x35c   : > { %s3582_s20 = smov %s2481_s22  ;;  %s3583_s21 = smov %s2485_s23 }
 0x35d   : > { %s3584_s22 = smov %s3587_s25  ;;  %s3585_s23 = smov %s3591_s26 }
 0x35e   :  { %14 = sbr.rel (!%p12_p11) target bundleno = 4 (0x4), region = 110 }

</bundles_post_ra>
